<compile_context>
chip_gen: v7x
topology: tpu7x:2x2x1
jax: 0.10.0
libtpu: 0.0.40
codegen_flags: <defaults>
</compile_context>

<pallas_src>
import functools

import jax
import jax.numpy as jnp
from jax.experimental import pallas as pl
from jax.experimental.pallas import tpu as pltpu


def _round_up(x, m):
    return ((x + m - 1) // m) * m


def _pick_tile(n_pad, requested, cap=None):
    """Largest multiple of 128 that divides n_pad, <= requested (and cap)."""
    t = min(requested, n_pad)
    if cap is not None:
        t = min(t, cap)
    t = max(128, (t // 128) * 128)
    while n_pad % t != 0:
        t -= 128
    return t


# --------------------------------------------------------------------------
# Fused kernel:  out[i, :] = bias + sum_k A[i, k] @ (X[k, :] @ W)
# Grid = (row tiles, k tiles); f32 accumulator in VMEM scratch.
# --------------------------------------------------------------------------
def gcn_fused_kernel(a_ref, x_ref, w_ref, b_ref, o_ref, acc_ref):
    k = pl.program_id(1)

    @pl.when(k == 0)
    def _():
        # Fold bias into accumulator init (saves an epilogue pass).
        acc_ref[...] = jnp.broadcast_to(
            b_ref[...].astype(jnp.float32), acc_ref.shape
        )

    # Recompute the support tile on the fly: 2*tile_k*F_in*F_pad flops,
    # a small fraction of the A matmul since F_in << F_pad.
    support = jnp.dot(
        x_ref[...], w_ref[...], preferred_element_type=jnp.float32
    ).astype(a_ref.dtype)

    acc_ref[...] += jnp.dot(
        a_ref[...], support, preferred_element_type=jnp.float32
    )

    @pl.when(k == pl.num_programs(1) - 1)
    def _():
        # Lane-dense (F_pad % 128 == 0) store.
        o_ref[...] = acc_ref[...].astype(o_ref.dtype)


# --------------------------------------------------------------------------
# Wrapper
# --------------------------------------------------------------------------
@functools.partial(jax.jit, static_argnames=("tile_n", "tile_k"))
def graph_convolution(
    adjacency,
    input_feature,
    weight,
    bias=None,
    *,
    tile_n=512,
    tile_k=512,
):
    N, _ = adjacency.shape
    F_in, F_out = weight.shape
    out_dtype = input_feature.dtype

    # Lane-dense padding of the output-feature axis.
    F_pad = _round_up(F_out, 128)
    w_pad = jnp.pad(weight, ((0, 0), (0, F_pad - F_out)))
    if bias is None:
        b_pad = jnp.zeros((1, F_pad), dtype=weight.dtype)
    else:
        b_pad = jnp.pad(
            jnp.reshape(bias, (1, F_out)), ((0, 0), (0, F_pad - F_out))
        )

    # Pad N to a multiple of 128 if needed (zero rows/cols: no-op on the math,
    # padded output rows are sliced away).
    N_pad = _round_up(N, 128)
    a_mm = adjacency
    x_mm = input_feature
    if N_pad != N:
        a_mm = jnp.pad(a_mm, ((0, N_pad - N), (0, N_pad - N)))
        x_mm = jnp.pad(x_mm, ((0, N_pad - N), (0, 0)))

    # Tile selection: MXU/lane aligned, divide N_pad, keep >= 2 row tiles so
    # the parallel row axis can feed both TensorCores on v7x.
    tn = _pick_tile(N_pad, tile_n, cap=max(128, N_pad // 2))
    tk = _pick_tile(N_pad, tile_k)
    n_row_tiles = N_pad // tn
    n_k_tiles = N_pad // tk

    a_item = jnp.dtype(a_mm.dtype).itemsize
    x_item = jnp.dtype(x_mm.dtype).itemsize
    w_item = jnp.dtype(w_pad.dtype).itemsize
    o_item = jnp.dtype(out_dtype).itemsize

    # VMEM budget derived from actual (double-buffered) tile sizes + headroom,
    # capped well below v7x's 64 MiB per-TC VMEM.
    vmem_bytes = (
        2 * tn * tk * a_item          # A tiles (double buffered)
        + 2 * tk * F_in * x_item      # X tiles
        + 2 * F_in * F_pad * w_item   # resident W (conservatively x2)
        + 2 * F_pad * w_item          # bias
        + 2 * tn * F_pad * o_item     # output tiles
        + tn * F_pad * 4              # f32 accumulator
    )
    vmem_limit = min(2 * vmem_bytes + (8 << 20), 56 << 20)

    out_padded = pl.pallas_call(
        gcn_fused_kernel,
        out_shape=jax.ShapeDtypeStruct((N_pad, F_pad), out_dtype),
        grid_spec=pltpu.PrefetchScalarGridSpec(
            num_scalar_prefetch=0,
            grid=(n_row_tiles, n_k_tiles),
            in_specs=[
                # adjacency tile (tn, tk)
                pl.BlockSpec((tn, tk), lambda i, k: (i, k)),
                # X k-tile (tk, F_in)
                pl.BlockSpec((tk, F_in), lambda i, k: (k, 0)),
                # W (resident, full)
                pl.BlockSpec((F_in, F_pad), lambda i, k: (0, 0)),
                # bias (broadcast)
                pl.BlockSpec((1, F_pad), lambda i, k: (0, 0)),
            ],
            out_specs=pl.BlockSpec((tn, F_pad), lambda i, k: (i, 0)),
            scratch_shapes=[pltpu.VMEM((tn, F_pad), jnp.float32)],
        ),
        compiler_params=pltpu.CompilerParams(
            dimension_semantics=("parallel", "arbitrary"),
            vmem_limit_bytes=int(vmem_limit),
        ),
        cost_estimate=pl.CostEstimate(
            flops=2 * N_pad * N_pad * F_pad
            + 2 * n_row_tiles * N_pad * F_in * F_pad,
            transcendentals=0,
            bytes_accessed=(
                N_pad * N_pad * a_item                     # A stream
                + n_row_tiles * N_pad * F_in * x_item      # X re-reads
                + F_in * F_pad * w_item
                + N_pad * F_pad * o_item
            ),
        ),
    )(a_mm, x_mm, w_pad, b_pad)

    return out_padded[:N, :F_out]


def kaiming_uniform(key, shape, dtype=jnp.float32):
    # torch.nn.init.kaiming_uniform_ default: a=0, mode='fan_in',
    # nonlinearity='leaky_relu' -> gain = sqrt(2); torch takes
    # fan_in = tensor.size(1) for a 2-D tensor (here = output_dim, matching
    # the module's (input_dim, output_dim) parameter layout).
    fan_in = shape[1]
    gain = jnp.sqrt(2.0)
    bound = gain * jnp.sqrt(3.0 / fan_in)
    return jax.random.uniform(key, shape, dtype, minval=-bound, maxval=bound)


if __name__ == "__main__":
    key = jax.random.PRNGKey(0)
    k_adj, k_x, k_w, k_b = jax.random.split(key, 4)

    N = 1024       # graph nodes (2 row tiles x 2 k tiles at the 512 defaults)
    F_in = 16      # input feature dim
    F_out = 32     # output feature dim

    # Parameters (same shapes as nn.Parameter in __init__). Bias is random
    # (instead of the module's zeros init) so the bias path is exercised.
    weight = kaiming_uniform(k_w, (F_in, F_out))
    bias = 0.1 * jax.random.normal(k_b, (F_out,), dtype=jnp.float32)

    # Deterministic inputs: random features + a row-normalized adjacency
    # (dense stand-in for the torch sparse adjacency; same math).
    x = jax.random.normal(k_x, (N, F_in), dtype=jnp.float32)
    mask = (jax.random.uniform(k_adj, (N, N)) < 0.05).astype(jnp.float32)
    adj = mask + jnp.eye(N, dtype=jnp.float32)           # add self-loops
    adj = adj / jnp.sum(adj, axis=1, keepdims=True)      # row-normalize
    # (For v5e/v6e perf: cast `adj` to bf16 HERE, once, outside the call.)

    out = graph_convolution(adj, x, weight, bias)
    out = jax.block_until_ready(out)

    # Reference check (plain JAX) -- same semantics as the torch forward.
    ref = adj @ (x @ weight) + bias[None, :]
    assert out.shape == (N, F_out)
    assert jnp.allclose(out, ref, atol=1e-4, rtol=1e-4), (
        float(jnp.max(jnp.abs(out - ref)))
    )

    print("KERNEL_OK")
</pallas_src>

<mosaic_0001>
module attributes {stable_mosaic.version = 11 : i64} {
  func.func @gcn_fused_kernel(%arg0: i32, %arg1: i32, %arg2: memref<512x512xf32, #tpu.memory_space<vmem>>, %arg3: memref<512x16xf32, #tpu.memory_space<vmem>>, %arg4: memref<16x128xf32, #tpu.memory_space<vmem>>, %arg5: memref<1x128xf32, #tpu.memory_space<vmem>>, %arg6: memref<512x128xf32, #tpu.memory_space<vmem>>, %arg7: memref<512x128xf32, #tpu.memory_space<vmem>>) attributes {dimension_semantics = [#tpu.dimension_semantics<parallel>, #tpu.dimension_semantics<arbitrary>], iteration_bounds = array<i64: 2, 2>, scalar_prefetch = 0 : i64, scratch_operands = 1 : i64, tpu.core_type = #tpu.core_type<tc>, window_params = [{transform_indices = @transform_0, window_bounds = array<i64: 512, 512>}, {transform_indices = @transform_1, window_bounds = array<i64: 512, 16>}, {pipeline_mode = #tpu.pipeline_mode<synchronous>, transform_indices = @transform_2, window_bounds = array<i64: 16, 128>}, {pipeline_mode = #tpu.pipeline_mode<synchronous>, transform_indices = @transform_3, window_bounds = array<i64: 1, 128>}, {transform_indices = @transform_4, window_bounds = array<i64: 512, 128>}]} {
    %c0_i32 = arith.constant 0 : i32
    %0 = arith.cmpi eq, %arg1, %c0_i32 : i32
    %1 = arith.extui %0 : i1 to i32
    %c0_i32_0 = arith.constant 0 : i32
    %2 = arith.cmpi ne, %1, %c0_i32_0 : i32
    scf.if %2 {
      %c0_12 = arith.constant 0 : index
      %c0_13 = arith.constant 0 : index
      %14 = vector.load %arg5[%c0_12, %c0_13] : memref<1x128xf32, #tpu.memory_space<vmem>>, vector<1x128xf32>
      %15 = vector.shape_cast %14 : vector<1x128xf32> to vector<1x128xf32>
      %16 = vector.broadcast %15 : vector<1x128xf32> to vector<512x128xf32>
      %c0_14 = arith.constant 0 : index
      %c0_15 = arith.constant 0 : index
      %17 = vector.load %arg7[%c0_14, %c0_15] : memref<512x128xf32, #tpu.memory_space<vmem>>, vector<512x128xf32>
      tpu.vector_store %arg7[%c0_14, %c0_15], %16 {strides = array<i32>} : memref<512x128xf32, #tpu.memory_space<vmem>>, vector<512x128xf32>,
    } else {
    }
    %c0 = arith.constant 0 : index
    %c0_1 = arith.constant 0 : index
    %3 = vector.load %arg3[%c0, %c0_1] : memref<512x16xf32, #tpu.memory_space<vmem>>, vector<512x16xf32>
    %c0_2 = arith.constant 0 : index
    %c0_3 = arith.constant 0 : index
    %4 = vector.load %arg4[%c0_2, %c0_3] : memref<16x128xf32, #tpu.memory_space<vmem>>, vector<16x128xf32>
    %cst = arith.constant dense<0.000000e+00> : vector<512x128xf32>
    %5 = tpu.matmul %3, %4, %cst {dimension_numbers = #tpu.dot_dimension_numbers<[1], [0], [0], [1], [0, 0, 1, 1], [], []>} : vector<512x16xf32>, vector<16x128xf32>, vector<512x128xf32> -> vector<512x128xf32>
    %c0_4 = arith.constant 0 : index
    %c0_5 = arith.constant 0 : index
    %6 = vector.load %arg7[%c0_4, %c0_5] : memref<512x128xf32, #tpu.memory_space<vmem>>, vector<512x128xf32>
    %c0_6 = arith.constant 0 : index
    %c0_7 = arith.constant 0 : index
    %7 = vector.load %arg2[%c0_6, %c0_7] : memref<512x512xf32, #tpu.memory_space<vmem>>, vector<512x512xf32>
    %cst_8 = arith.constant dense<0.000000e+00> : vector<512x128xf32>
    %8 = tpu.matmul %7, %5, %cst_8 {dimension_numbers = #tpu.dot_dimension_numbers<[1], [0], [0], [1], [0, 0, 1, 1], [], []>} : vector<512x512xf32>, vector<512x128xf32>, vector<512x128xf32> -> vector<512x128xf32>
    %9 = arith.addf %6, %8 : vector<512x128xf32>
    %c0_9 = arith.constant 0 : index
    %c0_10 = arith.constant 0 : index
    %10 = vector.load %arg7[%c0_9, %c0_10] : memref<512x128xf32, #tpu.memory_space<vmem>>, vector<512x128xf32>
    tpu.vector_store %arg7[%c0_9, %c0_10], %9 {strides = array<i32>} : memref<512x128xf32, #tpu.memory_space<vmem>>, vector<512x128xf32>,
    %c1_i32 = arith.constant 1 : i32
    %11 = arith.cmpi eq, %arg1, %c1_i32 : i32
    %12 = arith.extui %11 : i1 to i32
    %c0_i32_11 = arith.constant 0 : i32
    %13 = arith.cmpi ne, %12, %c0_i32_11 : i32
    scf.if %13 {
      %c0_12 = arith.constant 0 : index
      %c0_13 = arith.constant 0 : index
      %14 = vector.load %arg7[%c0_12, %c0_13] : memref<512x128xf32, #tpu.memory_space<vmem>>, vector<512x128xf32>
      %c0_14 = arith.constant 0 : index
      %c0_15 = arith.constant 0 : index
      %15 = vector.load %arg6[%c0_14, %c0_15] : memref<512x128xf32, #tpu.memory_space<vmem>>, vector<512x128xf32>
      tpu.vector_store %arg6[%c0_14, %c0_15], %14 {strides = array<i32>} : memref<512x128xf32, #tpu.memory_space<vmem>>, vector<512x128xf32>,
    } else {
    }
    return
  }
  func.func @transform_0(%arg0: i32, %arg1: i32) -> (i32, i32) {
    %c0_i32 = arith.constant 0 : i32
    return %arg0, %arg1 : i32, i32
  }
  func.func @transform_1(%arg0: i32, %arg1: i32) -> (i32, i32) {
    %c0_i32 = arith.constant 0 : i32
    %c0_i32_0 = arith.constant 0 : i32
    return %arg1, %c0_i32 : i32, i32
  }
  func.func @transform_2(%arg0: i32, %arg1: i32) -> (i32, i32) {
    %c0_i32 = arith.constant 0 : i32
    %c0_i32_0 = arith.constant 0 : i32
    %c0_i32_1 = arith.constant 0 : i32
    return %c0_i32, %c0_i32_0 : i32, i32
  }
  func.func @transform_3(%arg0: i32, %arg1: i32) -> (i32, i32) {
    %c0_i32 = arith.constant 0 : i32
    %c0_i32_0 = arith.constant 0 : i32
    %c0_i32_1 = arith.constant 0 : i32
    return %c0_i32, %c0_i32_0 : i32, i32
  }
  func.func @transform_4(%arg0: i32, %arg1: i32) -> (i32, i32) {
    %c0_i32 = arith.constant 0 : i32
    %c0_i32_0 = arith.constant 0 : i32
    return %arg0, %c0_i32 : i32, i32
  }
}

</mosaic_0001>

<bundles_post_ra>
// kernel: graph_convolution.1
= control target key start
LH: loop header
LB: loop body
LE: loop exit
PB: predicated region body
PF: predicated region fallthrough
CT: control target
= control target key end

     0   :  { %9 = vsyncpa [#allocation4], 0  ;;  %s3694_s0 = inlined_call_operand.hbm [shape: f32[1024,1024], index: 0, kind: input, shape index: {}]   ;;  %s3695_s1 = inlined_call_operand.vmem [shape: f32[1024,16], index: 1, kind: input, shape index: {}]   ;;  %s3696_s2 = inlined_call_operand.vmem [shape: f32[16,128], index: 2, kind: input, shape index: {}]   ;;  %s3697_s3 = inlined_call_operand.vmem [shape: f32[1,128], index: 3, kind: input, shape index: {}]   ;;  %s3698_s4 = inlined_call_operand.vmem [shape: f32[1024,128], index: 4, kind: output, shape index: {}]  }
   0x1   :  { %11 = vsyncpa [#allocation4 + $0x1], 0  ;;  %s2979_s15 = smov 0   ;;  %s2981_s16 = smov 0  }
   0x2   :  { %s2983_s17 = smov 0   ;;  %s2985_s18 = smov 0  }
   0x3   :  { %s2987_s19 = smov 0   ;;  %s2989_s20 = smov 0  }
   0x4   :  { %s2991_s21 = smov 0   ;;  %s2993_s22 = smov 0  }
   0x5 LB: > { %s2423_s23 = sadd.s32 4294967295, %s2947_s22   ;;  %s26_s24 = sadd.s32 1, %s2939_s20  ;;  %s2947_s22 = sphi %s2993_s22, %s17_s22   ;;  %s2943_s21 = sphi %s2991_s21, %s3711_s21   ;;  %s2939_s20 = sphi %s2989_s20, %s3710_s20   ;;  %s2935_s19 = sphi %s2987_s19, %s3709_s19   ;;  %s2931_s18 = sphi %s2985_s18, %s3708_s18   ;;  %s2927_s17 = sphi %s2983_s17, %s3707_s17   ;;  %s2923_s16 = sphi %s2981_s16, %s3706_s16   ;;  %s2919_s15 = sphi %s2979_s15, %s3705_s15  }
   0x6   : > { %p27_p0 = scmp.ge.s32.totalorder %s26_s24, 2  ;;  %s29_s25 = sadd.s32 1, %s2943_s21 }
   0x7   : > { %s38_s26 = sadd.s32 1, %s2927_s17  ;;  %p45_p1 = scmp.ne.s32.totalorder %s2927_s17, %s2923_s16 }
   0x8   : > { %s3713_s24 = smov (%p27_p0, %s26_s24), 0  ;;  %s3715_s25 = smov (!%p27_p0, %s29_s25), %s2943_s21 }
   0x9   : > { %3700 = sst [smem:[#allocation6_spill]] %s3713_s24  ;;  %s34_s27 = ssub.s32 %s2939_s20, %s3713_s24 }
   0xa   : > { %p46_p2 = scmp.eq.s32.totalorder %s2947_s22, 0  ;;  %p31_p3 = scmp.ge.s32.totalorder %s3715_s25, 2 }
   0xb   : > { %p51_p4 = scmp.ne.s32.totalorder %s2923_s16, %s2919_s15  ;;  %p52_p6 = scmp.eq.s32.totalorder %s2423_s23, 0 }
   0xc   : > { %p3030_p5 = por %p46_p2, %p45_p1  ;;  %s3717_s25 = smov (%p31_p3, %s3715_s25), 0 }
   0xd   : > { %p3036_p7 = por %p52_p6, %p51_p4  ;;  %s33_s30 = ssub.s32 %s2943_s21, %s3717_s25 }
   0xe   : > { %p2782_p8 = scmp.lt.s32.totalorder %s2947_s22, 4  ;;  %s35_s5 = sor.u32 %s34_s27, %s33_s30 }
   0xf   : > { %s175_s6 = sand.u32 1, %s2927_s17   ;;  %p36_p9 = scmp.eq.s32.totalorder %s35_s5, 0 }
  0x10   : > { %s2427_s7 = sshll.u32 %s175_s6, 11  ;;  %s2429_s8 = sshll.u32 %s2939_s20, 2 }
  0x11   : > { %s3046_s9 = scalar_select %p36_p9, %s2927_s17, %s38_s26  }
  0x12   : > { %s2507_s10 = sshll.u32 %s2943_s21, 9  ;;  %s179_s12 = scalar_lea.vmem [#allocation3], %s2427_s7 }
  0x13   : > { %s186_s11 = sadd.s32 %s2507_s10, %s2429_s8  ;;  %s189_s13 = sshll.u32 %s179_s12, 4  ;;  %s3049_s13 = int_to_ptr.vmem [resolvable:$true] %s189_s13 }
  0x14   : > { %s2431_s14 = sshll.u32 %s186_s11, 7  ;;  %p3060_p10 = pnand %p2782_p8, %p3030_p5 }
  0x15   : > { %s3054_s24 = scalar_lea.hbm %s3694_s0, %s2431_s14  ;;  %s3064_s27 = scalar_lea.sflag [#allocation4], %s175_s6 }
  0x16   : > { %s2851_s30 = scalar_lea.hbm %s3054_s24, 32768  ;;  %p2853_p12 = pneg %p3060_p10 }
  0x17   : > { %p2852_p11 = scmp.ne.s32.totalorder %s3054_s24, %s2851_s30  ;;  %s2856_s7 = scalar_lea.hbm %s3694_s0, 131072 }
  0x18   : > { %p2857_p1 = scmp.lt.u32.totalorder %s3054_s24, %s3694_s0  ;;  %p2858_p2 = scmp.lt.u32.totalorder %s2856_s7, %s2851_s30 }
  0x19   : > { %p2854_p13 = pnand %p2853_p12, %p2852_p11  ;;  %p2860_p4 = scmp.lt.u32.totalorder %s2851_s30, %s3054_s24 }
  0x1a   : > { %p2859_p3 = por %p2858_p2, %p2857_p1 }
  0x1b   : > { %p2855_p0 = pneg %p2854_p13 }
  0x1c   : > { %p2861_p5 = por %p2860_p4, %p2859_p3 }
  0x1e   : > { %p2862_p6 = pnand %p2861_p5, %p2855_p0 }
  0x20   : > { %2865 = shalt.err (!%p2862_p6)
}
  0x21   : > { %s2866_s6 = scalar_lea.vmem %s3049_s13, 32768  ;;  %s2949_s11 = smov [#allocation3]  }
  0x22   : > { %p2867_p8 = scmp.ne.s32.totalorder %s3049_s13, %s2866_s6  ;;  %s2871_s12 = sshll.u32 %s2949_s11, 4  ;;  %s2872_s12 = int_to_ptr.vmem [resolvable:$false] %s2871_s12 }
  0x23   : > { %s2873_s14 = scalar_lea.vmem %s2872_s12, 65536  ;;  %p2874_p13 = scmp.lt.s32.totalorder %s3049_s13, %s2872_s12 }
  0x24   : > { %p2869_p9 = pnand %p2867_p8, %p2853_p12  ;;  %p2875_p1 = scmp.lt.s32.totalorder %s2873_s14, %s2866_s6 }
  0x26   : > { %p2870_p11 = pneg %p2869_p9  ;;  %p2876_p2 = por %p2875_p1, %p2874_p13 }
  0x28   : > { %p2877_p3 = pnand %p2876_p2, %p2870_p11 }
  0x2a   : > { %2880 = shalt.err (!%p2877_p3)
}
  0x2b   : > { %s2950_s15 = smov 1024   ;;  %s2951_s23 = smov 512  }
  0x2c   : > { %s2952_s30 = smov 32   ;;  %p2432_p12 = scmp.ge.s32.totalorder %s2947_s22, 1 }
  0x2d   : > { %2781 = dma.hbm_to_vmem [thread:$0]  (!%p3060_p10), %s3054_s24, 32768, %s3049_s13, %s3064_s27, %s2950_s15, %s2951_s23, %s2952_s30  }
  0x2e   : > { %p206_p0 = scmp.lt.s32.totalorder %s2947_s22, 5 }
  0x30   : > { %p207_p4 = pnand %p2432_p12, %p206_p0 }
  0x31   : > { %s212_s28 = sand.u32 (!%p207_p4), 1, %s2923_s16  }
  0x32   : > { %210 = sbr.rel (%p207_p4) target bundleno = 858 (0x35a), region = 36  ;;  %s2433_s5 = sshll.u32 (!%p207_p4), %s212_s28, 11 }
  0x33   : > { %s213_s7 = scalar_lea.sflag (!%p207_p4), [#allocation4], %s212_s28  ;;  %s3095_s8 = scalar_lea.vmem (!%p207_p4), [#allocation3], %s2433_s5 }
  0x39   : > { %2914 = dma.done.wait (%p3036_p7), %s213_s7, 32768  }
  0x3a   : > { %2916 = vsyncadd (%p3036_p7), %s213_s7, 4294934528  ;;  %s2434_s26 = sshll.u32 %s2931_s18, 6  ;;  %s2436_s24 = sshll.u32 %s2935_s19, 6 }
  0x3b   : > { %p249_p10 = scmp.lt.s32.totalorder %s2434_s26, 127  ;;  %p255_p5 = scmp.lt.s32.totalorder %s2436_s24, 127 }
  0x3c   : > { %p2438_p7 = scmp.ne.s32.totalorder %s2931_s18, 0 }
  0x3d   : > { %s3719_s26 = smov (!%p249_p10, %s2434_s26), 127  ;;  %s3721_s24 = smov (!%p255_p5, %s2436_s24), 127 }
  0x3e   : > { %s2435_s13 = sshll.u32 %s3719_s26, 3  ;;  %s2437_s11 = sshll.u32 %s3721_s24, 3  ;;  %v3117_v0 = vld [vmem:[%s3697_s3] ss:$0 sm:$0xff] (!%p2438_p7) }
  0x3f   : > { %s3106_s6 = scalar_lea.vmem %s3695_s1, %s2435_s13  ;;  %s3111_s29 = scalar_lea.vmem %s3698_s4, %s2437_s11  ;;  %271 = vst [vmem:[#allocation2] sm:$0xff] (!%p2438_p7), %v3117_v0  ;;  %272 = vst [vmem:[#allocation2 + $0x8] sm:$0xff] (!%p2438_p7), %v3117_v0 }
  0x40   : > { %263 = sbr.rel (%p2438_p7) target bundleno = 95 (0x5f), region = 44  ;;  %273 = vst [vmem:[#allocation2 + $0x10] sm:$0xff] (!%p2438_p7), %v3117_v0  ;;  %274 = vst [vmem:[#allocation2 + $0x18] sm:$0xff] (!%p2438_p7), %v3117_v0 }
  0x41   : > { %275 = vst [vmem:[#allocation2 + $0x20] sm:$0xff] (!%p2438_p7), %v3117_v0  ;;  %276 = vst [vmem:[#allocation2 + $0x28] sm:$0xff] (!%p2438_p7), %v3117_v0 }
  0x42   : > { %277 = vst [vmem:[#allocation2 + $0x30] sm:$0xff] (!%p2438_p7), %v3117_v0  ;;  %278 = vst [vmem:[#allocation2 + $0x38] sm:$0xff] (!%p2438_p7), %v3117_v0 }
  0x43   : > { %279 = vst [vmem:[#allocation2 + $0x40] sm:$0xff] (!%p2438_p7), %v3117_v0  ;;  %280 = vst [vmem:[#allocation2 + $0x48] sm:$0xff] (!%p2438_p7), %v3117_v0 }
  0x44   : > { %281 = vst [vmem:[#allocation2 + $0x50] sm:$0xff] (!%p2438_p7), %v3117_v0  ;;  %282 = vst [vmem:[#allocation2 + $0x58] sm:$0xff] (!%p2438_p7), %v3117_v0 }
  0x45   : > { %283 = vst [vmem:[#allocation2 + $0x60] sm:$0xff] (!%p2438_p7), %v3117_v0  ;;  %284 = vst [vmem:[#allocation2 + $0x68] sm:$0xff] (!%p2438_p7), %v3117_v0 }
  0x46   : > { %285 = vst [vmem:[#allocation2 + $0x70] sm:$0xff] (!%p2438_p7), %v3117_v0  ;;  %286 = vst [vmem:[#allocation2 + $0x78] sm:$0xff] (!%p2438_p7), %v3117_v0 }
  0x47   : > { %287 = vst [vmem:[#allocation2 + $0x80] sm:$0xff] %v3117_v0  ;;  %288 = vst [vmem:[#allocation2 + $0x88] sm:$0xff] %v3117_v0 }
  0x48   : > { %289 = vst [vmem:[#allocation2 + $0x90] sm:$0xff] %v3117_v0  ;;  %290 = vst [vmem:[#allocation2 + $0x98] sm:$0xff] %v3117_v0 }
  0x49   : > { %291 = vst [vmem:[#allocation2 + $0xa0] sm:$0xff] %v3117_v0  ;;  %292 = vst [vmem:[#allocation2 + $0xa8] sm:$0xff] %v3117_v0 }
  0x4a   : > { %293 = vst [vmem:[#allocation2 + $0xb0] sm:$0xff] %v3117_v0  ;;  %294 = vst [vmem:[#allocation2 + $0xb8] sm:$0xff] %v3117_v0 }
  0x4b   : > { %295 = vst [vmem:[#allocation2 + $0xc0] sm:$0xff] %v3117_v0  ;;  %296 = vst [vmem:[#allocation2 + $0xc8] sm:$0xff] %v3117_v0 }
  0x4c   : > { %297 = vst [vmem:[#allocation2 + $0xd0] sm:$0xff] %v3117_v0  ;;  %298 = vst [vmem:[#allocation2 + $0xd8] sm:$0xff] %v3117_v0 }
  0x4d   : > { %299 = vst [vmem:[#allocation2 + $0xe0] sm:$0xff] %v3117_v0  ;;  %300 = vst [vmem:[#allocation2 + $0xe8] sm:$0xff] %v3117_v0 }
  0x4e   : > { %301 = vst [vmem:[#allocation2 + $0xf0] sm:$0xff] %v3117_v0  ;;  %302 = vst [vmem:[#allocation2 + $0xf8] sm:$0xff] %v3117_v0 }
  0x4f   : > { %303 = vst [vmem:[#allocation2 + $0x100] sm:$0xff] %v3117_v0  ;;  %304 = vst [vmem:[#allocation2 + $0x108] sm:$0xff] %v3117_v0 }
  0x50   : > { %305 = vst [vmem:[#allocation2 + $0x110] sm:$0xff] %v3117_v0  ;;  %306 = vst [vmem:[#allocation2 + $0x118] sm:$0xff] %v3117_v0 }
  0x51   : > { %307 = vst [vmem:[#allocation2 + $0x120] sm:$0xff] %v3117_v0  ;;  %308 = vst [vmem:[#allocation2 + $0x128] sm:$0xff] %v3117_v0 }
  0x52   : > { %309 = vst [vmem:[#allocation2 + $0x130] sm:$0xff] %v3117_v0  ;;  %310 = vst [vmem:[#allocation2 + $0x138] sm:$0xff] %v3117_v0 }
  0x53   : > { %311 = vst [vmem:[#allocation2 + $0x140] sm:$0xff] %v3117_v0  ;;  %312 = vst [vmem:[#allocation2 + $0x148] sm:$0xff] %v3117_v0 }
  0x54   : > { %313 = vst [vmem:[#allocation2 + $0x150] sm:$0xff] %v3117_v0  ;;  %314 = vst [vmem:[#allocation2 + $0x158] sm:$0xff] %v3117_v0 }
  0x55   : > { %315 = vst [vmem:[#allocation2 + $0x160] sm:$0xff] %v3117_v0  ;;  %316 = vst [vmem:[#allocation2 + $0x168] sm:$0xff] %v3117_v0 }
  0x56   : > { %317 = vst [vmem:[#allocation2 + $0x170] sm:$0xff] %v3117_v0  ;;  %318 = vst [vmem:[#allocation2 + $0x178] sm:$0xff] %v3117_v0 }
  0x57   : > { %319 = vst [vmem:[#allocation2 + $0x180] sm:$0xff] %v3117_v0  ;;  %320 = vst [vmem:[#allocation2 + $0x188] sm:$0xff] %v3117_v0 }
  0x58   : > { %321 = vst [vmem:[#allocation2 + $0x190] sm:$0xff] %v3117_v0  ;;  %322 = vst [vmem:[#allocation2 + $0x198] sm:$0xff] %v3117_v0 }
  0x59   : > { %323 = vst [vmem:[#allocation2 + $0x1a0] sm:$0xff] %v3117_v0  ;;  %324 = vst [vmem:[#allocation2 + $0x1a8] sm:$0xff] %v3117_v0 }
  0x5a   : > { %325 = vst [vmem:[#allocation2 + $0x1b0] sm:$0xff] %v3117_v0  ;;  %326 = vst [vmem:[#allocation2 + $0x1b8] sm:$0xff] %v3117_v0 }
  0x5b   : > { %327 = vst [vmem:[#allocation2 + $0x1c0] sm:$0xff] %v3117_v0  ;;  %328 = vst [vmem:[#allocation2 + $0x1c8] sm:$0xff] %v3117_v0 }
  0x5c   : > { %329 = vst [vmem:[#allocation2 + $0x1d0] sm:$0xff] %v3117_v0  ;;  %330 = vst [vmem:[#allocation2 + $0x1d8] sm:$0xff] %v3117_v0 }
  0x5d   : > { %331 = vst [vmem:[#allocation2 + $0x1e0] sm:$0xff] %v3117_v0  ;;  %332 = vst [vmem:[#allocation2 + $0x1e8] sm:$0xff] %v3117_v0 }
  0x5e   : > { %333 = vst [vmem:[#allocation2 + $0x1f0] sm:$0xff] %v3117_v0  ;;  %334 = vst [vmem:[#allocation2 + $0x1f8] sm:$0xff] %v3117_v0 }
  0x5f PF: > { %v399_v1 = vld [vmem:[%s3696_s2] sm:$0xff]  ;;  %v400_v2 = vld [vmem:[%s3696_s2 + $0x8] sm:$0xff]  ;;  %vm401_vm0 = vcmask 130048   ;;  %v337_v8 = vld [vmem:[%s3106_s6 + $0x10] sm:$0xff]  ;;  %p2504_p6 = scmp.ne.s32.totalorder %s2931_s18, 1 }
  0x60   : > { %v335_v3 = vld [vmem:[%s3106_s6] sm:$0xff]  ;;  %v2674_v4 = vpack.c.bf16 %v400_v2, %v399_v1  ;;  %v336_v6 = vld [vmem:[%s3106_s6 + $0x8] sm:$0xff]  ;;  %v369_v9 = vld [vmem:[%s3106_s6 + $0x110] sm:$0xff] }
  0x61   : > { %2578 = vmatprep.mubr.msk.f32.mxu0 %vm401_vm0, %v335_v3  ;;  %v367_v5 = vld [vmem:[%s3106_s6 + $0x100] sm:$0xff]  ;;  %v368_v7 = vld [vmem:[%s3106_s6 + $0x108] sm:$0xff]  ;;  %v338_v10 = vld [vmem:[%s3106_s6 + $0x18] sm:$0xff] }
  0x62   : > { %2626 = vmatprep.mubr.msk.f32.mxu1 %vm401_vm0, %v367_v5  ;;  %2675 = vmatprep.subr.bf16.mxu0 %v2674_v4  ;;  %v370_v11 = vld [vmem:[%s3106_s6 + $0x118] sm:$0xff]  ;;  %v339_v12 = vld [vmem:[%s3106_s6 + $0x20] sm:$0xff]  ;;  %v340_v14 = vld [vmem:[%s3106_s6 + $0x28] sm:$0xff] }
  0x63   : > { %2774 = vmatprep.subr.bf16.mxu1 %v2674_v4  ;;  %2677 = vmatpush3.bf16.msra.mxu0 %v2674_v4  ;;  %v371_v13 = vld [vmem:[%s3106_s6 + $0x120] sm:$0xff]  ;;  %v372_v15 = vld [vmem:[%s3106_s6 + $0x128] sm:$0xff]  ;;  %v341_v16 = vld [vmem:[%s3106_s6 + $0x30] sm:$0xff] }
  0x64   : > { %2775 = vmatpush3.bf16.msra.mxu1 %v2674_v4  ;;  %v373_v17 = vld [vmem:[%s3106_s6 + $0x130] sm:$0xff]  ;;  %v342_v18 = vld [vmem:[%s3106_s6 + $0x38] sm:$0xff]  ;;  %v343_v20 = vld [vmem:[%s3106_s6 + $0x40] sm:$0xff]  ;;  %v2953_v4 = vmov 0.0|0.0  }
  0x65   : > { %v374_v19 = vld [vmem:[%s3106_s6 + $0x138] sm:$0xff]  ;;  %v375_v21 = vld [vmem:[%s3106_s6 + $0x140] sm:$0xff]  ;;  %v344_v22 = vld [vmem:[%s3106_s6 + $0x48] sm:$0xff]  ;;  %2678 = vmatprep.subr.bf16.mxu1 %v2953_v4  ;;  %2726 = vmatprep.subr.bf16.mxu0 %v2953_v4 }
  0x66   : > { %2579 = vmatmul.mubr.msk.f32.vlgmr.msra.gmra.mrb[0].mxu0 %vm401_vm0, %v336_v6  ;;  %v376_v23 = vld [vmem:[%s3106_s6 + $0x148] sm:$0xff]  ;;  %v345_v24 = vld [vmem:[%s3106_s6 + $0x50] sm:$0xff]  ;;  %v346_v26 = vld [vmem:[%s3106_s6 + $0x58] sm:$0xff] }
  0x67   : > { %2627 = vmatmul.mubr.msk.f32.vlgmr.msra.gmra.mrb[0].mxu1 %vm401_vm0, %v368_v7  ;;  %2581 = vmatprep.mubr.msk.f32.mxu0 %vm401_vm0, %v337_v8  ;;  %v377_v25 = vld [vmem:[%s3106_s6 + $0x150] sm:$0xff]  ;;  %v378_v27 = vld [vmem:[%s3106_s6 + $0x158] sm:$0xff]  ;;  %v347_v28 = vld [vmem:[%s3106_s6 + $0x60] sm:$0xff] }
  0x68   : > { %2629 = vmatprep.mubr.msk.f32.mxu1 %vm401_vm0, %v369_v9  ;;  %v379_v29 = vld [vmem:[%s3106_s6 + $0x160] sm:$0xff]  ;;  %v348_v30 = vld [vmem:[%s3106_s6 + $0x68] sm:$0xff]  ;;  %v349_v32 = vld [vmem:[%s3106_s6 + $0x70] sm:$0xff] }
  0x69   : > { %v380_v31 = vld [vmem:[%s3106_s6 + $0x168] sm:$0xff]  ;;  %v381_v33 = vld [vmem:[%s3106_s6 + $0x170] sm:$0xff]  ;;  %v350_v34 = vld [vmem:[%s3106_s6 + $0x78] sm:$0xff] }
  0x6a   : > { %2582 = vmatmul.mubr.msk.f32.gmra.mrb[2].mxu0 %vm401_vm0, %v338_v10  ;;  %v382_v35 = vld [vmem:[%s3106_s6 + $0x178] sm:$0xff]  ;;  %v351_v36 = vld [vmem:[%s3106_s6 + $0x80] sm:$0xff]  ;;  %v352_v38 = vld [vmem:[%s3106_s6 + $0x88] sm:$0xff] }
  0x6b   : > { %2630 = vmatmul.mubr.msk.f32.gmra.mrb[2].mxu1 %vm401_vm0, %v370_v11  ;;  %2584 = vmatprep.mubr.msk.f32.mxu0 %vm401_vm0, %v339_v12  ;;  %v383_v37 = vld [vmem:[%s3106_s6 + $0x180] sm:$0xff]  ;;  %v384_v39 = vld [vmem:[%s3106_s6 + $0x188] sm:$0xff]  ;;  %v353_v40 = vld [vmem:[%s3106_s6 + $0x90] sm:$0xff] }
  0x6c   : > { %2632 = vmatprep.mubr.msk.f32.mxu1 %vm401_vm0, %v371_v13  ;;  %v385_v41 = vld [vmem:[%s3106_s6 + $0x190] sm:$0xff]  ;;  %v354_v42 = vld [vmem:[%s3106_s6 + $0x98] sm:$0xff]  ;;  %v355_v44 = vld [vmem:[%s3106_s6 + $0xa0] sm:$0xff] }
  0x6d   : > { %v386_v43 = vld [vmem:[%s3106_s6 + $0x198] sm:$0xff]  ;;  %v387_v45 = vld [vmem:[%s3106_s6 + $0x1a0] sm:$0xff]  ;;  %v356_v46 = vld [vmem:[%s3106_s6 + $0xa8] sm:$0xff] }
  0x6e   : > { %2585 = vmatmul.mubr.msk.f32.gmra.mrb[4].mxu0 %vm401_vm0, %v340_v14  ;;  %v388_v47 = vld [vmem:[%s3106_s6 + $0x1a8] sm:$0xff]  ;;  %v357_v48 = vld [vmem:[%s3106_s6 + $0xb0] sm:$0xff]  ;;  %v358_v50 = vld [vmem:[%s3106_s6 + $0xb8] sm:$0xff] }
  0x6f   : > { %2633 = vmatmul.mubr.msk.f32.gmra.mrb[4].mxu1 %vm401_vm0, %v372_v15  ;;  %2587 = vmatprep.mubr.msk.f32.mxu0 %vm401_vm0, %v341_v16  ;;  %v389_v49 = vld [vmem:[%s3106_s6 + $0x1b0] sm:$0xff]  ;;  %v390_v51 = vld [vmem:[%s3106_s6 + $0x1b8] sm:$0xff]  ;;  %v359_v52 = vld [vmem:[%s3106_s6 + $0xc0] sm:$0xff] }
  0x70   : > { %2635 = vmatprep.mubr.msk.f32.mxu1 %vm401_vm0, %v373_v17  ;;  %v391_v53 = vld [vmem:[%s3106_s6 + $0x1c0] sm:$0xff]  ;;  %v360_v54 = vld [vmem:[%s3106_s6 + $0xc8] sm:$0xff]  ;;  %v361_v56 = vld [vmem:[%s3106_s6 + $0xd0] sm:$0xff] }
  0x71   : > { %v392_v55 = vld [vmem:[%s3106_s6 + $0x1c8] sm:$0xff]  ;;  %v393_v57 = vld [vmem:[%s3106_s6 + $0x1d0] sm:$0xff]  ;;  %v362_v58 = vld [vmem:[%s3106_s6 + $0xd8] sm:$0xff] }
  0x72   : > { %2588 = vmatmul.mubr.msk.f32.gmra.mrb[6].mxu0 %vm401_vm0, %v342_v18  ;;  %v394_v59 = vld [vmem:[%s3106_s6 + $0x1d8] sm:$0xff]  ;;  %v363_v60 = vld [vmem:[%s3106_s6 + $0xe0] sm:$0xff]  ;;  %v364_v62 = vld [vmem:[%s3106_s6 + $0xe8] sm:$0xff] }
  0x73   : > { %2636 = vmatmul.mubr.msk.f32.gmra.mrb[6].mxu1 %vm401_vm0, %v374_v19  ;;  %2590 = vmatprep.mubr.msk.f32.mxu0 %vm401_vm0, %v343_v20  ;;  %v395_v61 = vld [vmem:[%s3106_s6 + $0x1e0] sm:$0xff]  ;;  %v396_v63 = vld [vmem:[%s3106_s6 + $0x1e8] sm:$0xff]  ;;  %v365_v0 = vld [vmem:[%s3106_s6 + $0xf0] sm:$0xff] }
  0x74   : > { %2638 = vmatprep.mubr.msk.f32.mxu1 %vm401_vm0, %v375_v21  ;;  %v397_v1 = vld [vmem:[%s3106_s6 + $0x1f0] sm:$0xff]  ;;  %v366_v2 = vld [vmem:[%s3106_s6 + $0xf8] sm:$0xff]  ;;  %v1044_v5 = vld [vmem:[%s3095_s8 + $0x8] sm:$0xff] }
  0x75   : > { %v398_v3 = vld [vmem:[%s3106_s6 + $0x1f8] sm:$0xff] }
  0x76   : > { %2591 = vmatmul.mubr.msk.f32.gmra.mrb[8].mxu0 %vm401_vm0, %v344_v22  ;;  %v1046_v6 = vld [vmem:[%s3095_s8 + $0x18] sm:$0xff] }
  0x77   : > { %2639 = vmatmul.mubr.msk.f32.gmra.mrb[8].mxu1 %vm401_vm0, %v376_v23  ;;  %2593 = vmatprep.mubr.msk.f32.mxu0 %vm401_vm0, %v345_v24 }
  0x78   : > { %2641 = vmatprep.mubr.msk.f32.mxu1 %vm401_vm0, %v377_v25 }
  0x7a   : > { %2594 = vmatmul.mubr.msk.f32.gmra.mrb[10].mxu0 %vm401_vm0, %v346_v26 }
  0x7b   : > { %2642 = vmatmul.mubr.msk.f32.gmra.mrb[10].mxu1 %vm401_vm0, %v378_v27  ;;  %2596 = vmatprep.mubr.msk.f32.mxu0 %vm401_vm0, %v347_v28 }
  0x7c   : > { %2644 = vmatprep.mubr.msk.f32.mxu1 %vm401_vm0, %v379_v29 }
  0x7e   : > { %2597 = vmatmul.mubr.msk.f32.gmra.mrb[12].mxu0 %vm401_vm0, %v348_v30 }
  0x7f   : > { %2645 = vmatmul.mubr.msk.f32.gmra.mrb[12].mxu1 %vm401_vm0, %v380_v31  ;;  %2599 = vmatprep.mubr.msk.f32.mxu0 %vm401_vm0, %v349_v32 }
  0x80   : > { %2647 = vmatprep.mubr.msk.f32.mxu1 %vm401_vm0, %v381_v33 }
  0x82   : > { %2600 = vmatmul.mubr.msk.f32.gmra.mrb[14].mxu0 %vm401_vm0, %v350_v34 }
  0x83   : > { %2648 = vmatmul.mubr.msk.f32.gmra.mrb[14].mxu1 %vm401_vm0, %v382_v35  ;;  %2602 = vmatprep.mubr.msk.f32.mxu0 %vm401_vm0, %v351_v36 }
  0x84   : > { %2650 = vmatprep.mubr.msk.f32.mxu1 %vm401_vm0, %v383_v37 }
  0x86   : > { %2603 = vmatmul.mubr.msk.f32.gmra.mrb[16].mxu0 %vm401_vm0, %v352_v38 }
  0x87   : > { %2651 = vmatmul.mubr.msk.f32.gmra.mrb[16].mxu1 %vm401_vm0, %v384_v39  ;;  %2605 = vmatprep.mubr.msk.f32.mxu0 %vm401_vm0, %v353_v40 }
  0x88   : > { %2653 = vmatprep.mubr.msk.f32.mxu1 %vm401_vm0, %v385_v41 }
  0x8a   : > { %2606 = vmatmul.mubr.msk.f32.gmra.mrb[18].mxu0 %vm401_vm0, %v354_v42 }
  0x8b   : > { %2654 = vmatmul.mubr.msk.f32.gmra.mrb[18].mxu1 %vm401_vm0, %v386_v43  ;;  %2608 = vmatprep.mubr.msk.f32.mxu0 %vm401_vm0, %v355_v44 }
  0x8c   : > { %2656 = vmatprep.mubr.msk.f32.mxu1 %vm401_vm0, %v387_v45 }
  0x8e   : > { %2609 = vmatmul.mubr.msk.f32.gmra.mrb[20].mxu0 %vm401_vm0, %v356_v46 }
  0x8f   : > { %2657 = vmatmul.mubr.msk.f32.gmra.mrb[20].mxu1 %vm401_vm0, %v388_v47  ;;  %2611 = vmatprep.mubr.msk.f32.mxu0 %vm401_vm0, %v357_v48 }
  0x90   : > { %2659 = vmatprep.mubr.msk.f32.mxu1 %vm401_vm0, %v389_v49 }
  0x92   : > { %2612 = vmatmul.mubr.msk.f32.gmra.mrb[22].mxu0 %vm401_vm0, %v358_v50 }
  0x93   : > { %2660 = vmatmul.mubr.msk.f32.gmra.mrb[22].mxu1 %vm401_vm0, %v390_v51  ;;  %2614 = vmatprep.mubr.msk.f32.mxu0 %vm401_vm0, %v359_v52 }
  0x94   : > { %2662 = vmatprep.mubr.msk.f32.mxu1 %vm401_vm0, %v391_v53 }
  0x96   : > { %2615 = vmatmul.mubr.msk.f32.gmra.mrb[24].mxu0 %vm401_vm0, %v360_v54 }
  0x97   : > { %2663 = vmatmul.mubr.msk.f32.gmra.mrb[24].mxu1 %vm401_vm0, %v392_v55  ;;  %2617 = vmatprep.mubr.msk.f32.mxu0 %vm401_vm0, %v361_v56 }
  0x98   : > { %2665 = vmatprep.mubr.msk.f32.mxu1 %vm401_vm0, %v393_v57 }
  0x9a   : > { %2618 = vmatmul.mubr.msk.f32.gmra.mrb[26].mxu0 %vm401_vm0, %v362_v58 }
  0x9b   : > { %2666 = vmatmul.mubr.msk.f32.gmra.mrb[26].mxu1 %vm401_vm0, %v394_v59  ;;  %2620 = vmatprep.mubr.msk.f32.mxu0 %vm401_vm0, %v363_v60 }
  0x9c   : > { %2668 = vmatprep.mubr.msk.f32.mxu1 %vm401_vm0, %v395_v61 }
  0x9e   : > { %2621 = vmatmul.mubr.msk.f32.gmra.mrb[28].mxu0 %vm401_vm0, %v364_v62 }
  0x9f   : > { %2669 = vmatmul.mubr.msk.f32.gmra.mrb[28].mxu1 %vm401_vm0, %v396_v63  ;;  %2623 = vmatprep.mubr.msk.f32.mxu0 %vm401_vm0, %v365_v0 }
  0xa0   : > { %2671 = vmatprep.mubr.msk.f32.mxu1 %vm401_vm0, %v397_v1 }
  0xa2   : > { %2624 = vmatmul.mubr.msk.f32.gmra.mrb[30].mxu0 %vm401_vm0, %v366_v2 }
  0xa3   : > { %2672 = vmatmul.mubr.msk.f32.gmra.mrb[30].mxu1 %vm401_vm0, %v398_v3  ;;  %1748 = vmatprep.mubr.f32.mxu0 %v1046_v6 }
  0xa4   : > { %1363 = vmatprep.mubr.f32.mxu1 %v1044_v5 }
 0x139   : > { %v2580_v7 = vpop.f32.mrb[0].mxu0 }
 0x13a   : > { %v2628_v8 = vpop.f32.mrb[0].mxu1  ;;  %v660_v9 = vpop.f32.mrb[1].mxu0 }
 0x13b   : > { %v820_v10 = vpop.f32.mrb[1].mxu1  ;;  %v2679_v11 = vpack.c.bf16 %v2580_v7, %v660_v9 }
 0x13c   : > { %v2727_v12 = vpack.c.bf16 %v2628_v8, %v820_v10 }
 0x13d   : > { %v2583_v13 = vpop.f32.mrb[2].mxu0  ;;  %2680 = vmatpush1.bf16.msra.mxu1 %v2679_v11 }
 0x13e   : > { %v2631_v14 = vpop.f32.mrb[2].mxu1  ;;  %2728 = vmatpush1.bf16.msra.mxu0 %v2727_v12  ;;  %v670_v15 = vpop.f32.mrb[3].mxu0  ;;  %2681 = vmatprep.subr.bf16.mxu1 %v2953_v4 }
 0x13f   : > { %v830_v16 = vpop.f32.mrb[3].mxu1  ;;  %2729 = vmatprep.subr.bf16.mxu0 %v2953_v4  ;;  %v2682_v17 = vpack.c.bf16 %v2583_v13, %v670_v15 }
 0x140   : > { %v2730_v18 = vpack.c.bf16 %v2631_v14, %v830_v16 }
 0x141   : > { %v2586_v19 = vpop.f32.mrb[4].mxu0  ;;  %2683 = vmatpush1.bf16.msra.mxu1 %v2682_v17 }
 0x142   : > { %v2634_v20 = vpop.f32.mrb[4].mxu1  ;;  %2731 = vmatpush1.bf16.msra.mxu0 %v2730_v18  ;;  %v680_v21 = vpop.f32.mrb[5].mxu0  ;;  %2684 = vmatprep.subr.bf16.mxu1 %v2953_v4 }
 0x143   : > { %v840_v22 = vpop.f32.mrb[5].mxu1  ;;  %2732 = vmatprep.subr.bf16.mxu0 %v2953_v4  ;;  %v2685_v23 = vpack.c.bf16 %v2586_v19, %v680_v21 }
 0x144   : > { %v2733_v24 = vpack.c.bf16 %v2634_v20, %v840_v22 }
 0x145   : > { %v2589_v25 = vpop.f32.mrb[6].mxu0  ;;  %2686 = vmatpush1.bf16.msra.mxu1 %v2685_v23 }
 0x146   : > { %v2637_v26 = vpop.f32.mrb[6].mxu1  ;;  %2734 = vmatpush1.bf16.msra.mxu0 %v2733_v24  ;;  %v690_v27 = vpop.f32.mrb[7].mxu0  ;;  %2687 = vmatprep.subr.bf16.mxu1 %v2953_v4 }
 0x147   : > { %v850_v28 = vpop.f32.mrb[7].mxu1  ;;  %2735 = vmatprep.subr.bf16.mxu0 %v2953_v4  ;;  %v2688_v29 = vpack.c.bf16 %v2589_v25, %v690_v27 }
 0x148   : > { %v2736_v30 = vpack.c.bf16 %v2637_v26, %v850_v28 }
 0x149   : > { %v2592_v31 = vpop.f32.mrb[8].mxu0  ;;  %2689 = vmatpush1.bf16.msra.mxu1 %v2688_v29 }
 0x14a   : > { %v2640_v32 = vpop.f32.mrb[8].mxu1  ;;  %2737 = vmatpush1.bf16.msra.mxu0 %v2736_v30  ;;  %v700_v33 = vpop.f32.mrb[9].mxu0  ;;  %2690 = vmatprep.subr.bf16.mxu1 %v2953_v4 }
 0x14b   : > { %v860_v34 = vpop.f32.mrb[9].mxu1  ;;  %2738 = vmatprep.subr.bf16.mxu0 %v2953_v4  ;;  %v2691_v35 = vpack.c.bf16 %v2592_v31, %v700_v33 }
 0x14c   : > { %v2739_v36 = vpack.c.bf16 %v2640_v32, %v860_v34 }
 0x14d   : > { %v2595_v37 = vpop.f32.mrb[10].mxu0  ;;  %2692 = vmatpush1.bf16.msra.mxu1 %v2691_v35 }
 0x14e   : > { %v2643_v38 = vpop.f32.mrb[10].mxu1  ;;  %2740 = vmatpush1.bf16.msra.mxu0 %v2739_v36  ;;  %v710_v39 = vpop.f32.mrb[11].mxu0  ;;  %2693 = vmatprep.subr.bf16.mxu1 %v2953_v4 }
 0x14f   : > { %v870_v40 = vpop.f32.mrb[11].mxu1  ;;  %2741 = vmatprep.subr.bf16.mxu0 %v2953_v4  ;;  %v2694_v41 = vpack.c.bf16 %v2595_v37, %v710_v39 }
 0x150   : > { %v2742_v42 = vpack.c.bf16 %v2643_v38, %v870_v40  ;;  %v1043_v40 = vld [vmem:[%s3095_s8] sm:$0xff] }
 0x151   : > { %v2598_v43 = vpop.f32.mrb[12].mxu0  ;;  %2695 = vmatpush1.bf16.msra.mxu1 %v2694_v41  ;;  %v1045_v41 = vld [vmem:[%s3095_s8 + $0x10] sm:$0xff] }
 0x152   : > { %v2646_v44 = vpop.f32.mrb[12].mxu1  ;;  %2743 = vmatpush1.bf16.msra.mxu0 %v2742_v42  ;;  %v720_v45 = vpop.f32.mrb[13].mxu0  ;;  %2696 = vmatprep.subr.bf16.mxu1 %v2953_v4  ;;  %v1048_v42 = vld [vmem:[%s3095_s8 + $0x28] sm:$0xff] }
 0x153   : > { %v880_v46 = vpop.f32.mrb[13].mxu1  ;;  %2744 = vmatprep.subr.bf16.mxu0 %v2953_v4  ;;  %v2697_v47 = vpack.c.bf16 %v2598_v43, %v720_v45  ;;  %v1050_v43 = vld [vmem:[%s3095_s8 + $0x38] sm:$0xff]  ;;  %v1052_v45 = vld [vmem:[%s3095_s8 + $0x48] sm:$0xff] }
 0x154   : > { %v2745_v48 = vpack.c.bf16 %v2646_v44, %v880_v46  ;;  %v1047_v44 = vld [vmem:[%s3095_s8 + $0x20] sm:$0xff]  ;;  %v1054_v46 = vld [vmem:[%s3095_s8 + $0x58] sm:$0xff] }
 0x155   : > { %v2601_v49 = vpop.f32.mrb[14].mxu0  ;;  %2698 = vmatpush1.bf16.msra.mxu1 %v2697_v47  ;;  %v1051_v47 = vld [vmem:[%s3095_s8 + $0x40] sm:$0xff] }
 0x156   : > { %v2649_v50 = vpop.f32.mrb[14].mxu1  ;;  %2746 = vmatpush1.bf16.msra.mxu0 %v2745_v48  ;;  %v730_v51 = vpop.f32.mrb[15].mxu0  ;;  %2699 = vmatprep.subr.bf16.mxu1 %v2953_v4  ;;  %v1053_v48 = vld [vmem:[%s3095_s8 + $0x50] sm:$0xff] }
 0x157   : > { %v890_v52 = vpop.f32.mrb[15].mxu1  ;;  %2747 = vmatprep.subr.bf16.mxu0 %v2953_v4  ;;  %v2700_v53 = vpack.c.bf16 %v2601_v49, %v730_v51  ;;  %v1056_v49 = vld [vmem:[%s3095_s8 + $0x68] sm:$0xff]  ;;  %v1055_v51 = vld [vmem:[%s3095_s8 + $0x60] sm:$0xff] }
 0x158   : > { %v2748_v54 = vpack.c.bf16 %v2649_v50, %v890_v52  ;;  %v1058_v50 = vld [vmem:[%s3095_s8 + $0x78] sm:$0xff]  ;;  %v1057_v52 = vld [vmem:[%s3095_s8 + $0x70] sm:$0xff] }
 0x159   : > { %v2604_v55 = vpop.f32.mrb[16].mxu0  ;;  %2701 = vmatpush1.bf16.msra.mxu1 %v2700_v53  ;;  %v1060_v53 = vld [vmem:[%s3095_s8 + $0x88] sm:$0xff] }
 0x15a   : > { %v2652_v56 = vpop.f32.mrb[16].mxu1  ;;  %2749 = vmatpush1.bf16.msra.mxu0 %v2748_v54  ;;  %v740_v57 = vpop.f32.mrb[17].mxu0  ;;  %2702 = vmatprep.subr.bf16.mxu1 %v2953_v4  ;;  %v1062_v54 = vld [vmem:[%s3095_s8 + $0x98] sm:$0xff] }
 0x15b   : > { %v900_v58 = vpop.f32.mrb[17].mxu1  ;;  %2750 = vmatprep.subr.bf16.mxu0 %v2953_v4  ;;  %v2703_v59 = vpack.c.bf16 %v2604_v55, %v740_v57  ;;  %v1059_v55 = vld [vmem:[%s3095_s8 + $0x80] sm:$0xff]  ;;  %v1064_v57 = vld [vmem:[%s3095_s8 + $0xa8] sm:$0xff] }
 0x15c   : > { %v2751_v60 = vpack.c.bf16 %v2652_v56, %v900_v58  ;;  %v1061_v56 = vld [vmem:[%s3095_s8 + $0x90] sm:$0xff]  ;;  %v1066_v58 = vld [vmem:[%s3095_s8 + $0xb8] sm:$0xff] }
 0x15d   : > { %v2607_v61 = vpop.f32.mrb[18].mxu0  ;;  %2704 = vmatpush1.bf16.msra.mxu1 %v2703_v59  ;;  %v1063_v59 = vld [vmem:[%s3095_s8 + $0xa0] sm:$0xff] }
 0x15e   : > { %v2655_v62 = vpop.f32.mrb[18].mxu1  ;;  %2752 = vmatpush1.bf16.msra.mxu0 %v2751_v60  ;;  %v750_v63 = vpop.f32.mrb[19].mxu0  ;;  %2705 = vmatprep.subr.bf16.mxu1 %v2953_v4  ;;  %v1065_v60 = vld [vmem:[%s3095_s8 + $0xb0] sm:$0xff] }
 0x15f   : > { %v910_v0 = vpop.f32.mrb[19].mxu1  ;;  %2753 = vmatprep.subr.bf16.mxu0 %v2953_v4  ;;  %v2706_v1 = vpack.c.bf16 %v2607_v61, %v750_v63  ;;  %v1068_v61 = vld [vmem:[%s3095_s8 + $0xc8] sm:$0xff]  ;;  %v1067_v63 = vld [vmem:[%s3095_s8 + $0xc0] sm:$0xff] }
 0x160   : > { %v2754_v2 = vpack.c.bf16 %v2655_v62, %v910_v0  ;;  %v1070_v62 = vld [vmem:[%s3095_s8 + $0xd8] sm:$0xff]  ;;  %v1069_v0 = vld [vmem:[%s3095_s8 + $0xd0] sm:$0xff] }
 0x161   : > { %v2610_v3 = vpop.f32.mrb[20].mxu0  ;;  %2707 = vmatpush1.bf16.msra.mxu1 %v2706_v1  ;;  %v1072_v1 = vld [vmem:[%s3095_s8 + $0xe8] sm:$0xff] }
 0x162   : > { %v2658_v5 = vpop.f32.mrb[20].mxu1  ;;  %2755 = vmatpush1.bf16.msra.mxu0 %v2754_v2  ;;  %v760_v6 = vpop.f32.mrb[21].mxu0  ;;  %2708 = vmatprep.subr.bf16.mxu1 %v2953_v4  ;;  %v1074_v2 = vld [vmem:[%s3095_s8 + $0xf8] sm:$0xff] }
 0x163   : > { %v920_v7 = vpop.f32.mrb[21].mxu1  ;;  %2756 = vmatprep.subr.bf16.mxu0 %v2953_v4  ;;  %v2709_v8 = vpack.c.bf16 %v2610_v3, %v760_v6  ;;  %v1071_v3 = vld [vmem:[%s3095_s8 + $0xe0] sm:$0xff]  ;;  %v1076_v6 = vld [vmem:[%s3095_s8 + $0x108] sm:$0xff] }
 0x164   : > { %v2757_v9 = vpack.c.bf16 %v2658_v5, %v920_v7  ;;  %v1073_v5 = vld [vmem:[%s3095_s8 + $0xf0] sm:$0xff]  ;;  %v1078_v7 = vld [vmem:[%s3095_s8 + $0x118] sm:$0xff] }
 0x165   : > { %v2613_v10 = vpop.f32.mrb[22].mxu0  ;;  %2710 = vmatpush1.bf16.msra.mxu1 %v2709_v8  ;;  %v1075_v8 = vld [vmem:[%s3095_s8 + $0x100] sm:$0xff] }
 0x166   : > { %v2661_v11 = vpop.f32.mrb[22].mxu1  ;;  %2758 = vmatpush1.bf16.msra.mxu0 %v2757_v9  ;;  %v770_v12 = vpop.f32.mrb[23].mxu0  ;;  %2711 = vmatprep.subr.bf16.mxu1 %v2953_v4  ;;  %v1077_v9 = vld [vmem:[%s3095_s8 + $0x110] sm:$0xff] }
 0x167   : > { %v930_v13 = vpop.f32.mrb[23].mxu1  ;;  %2759 = vmatprep.subr.bf16.mxu0 %v2953_v4  ;;  %v2712_v14 = vpack.c.bf16 %v2613_v10, %v770_v12  ;;  %v1080_v10 = vld [vmem:[%s3095_s8 + $0x128] sm:$0xff]  ;;  %v1079_v12 = vld [vmem:[%s3095_s8 + $0x120] sm:$0xff] }
 0x168   : > { %v2760_v15 = vpack.c.bf16 %v2661_v11, %v930_v13  ;;  %v1082_v11 = vld [vmem:[%s3095_s8 + $0x138] sm:$0xff]  ;;  %v1081_v13 = vld [vmem:[%s3095_s8 + $0x130] sm:$0xff] }
 0x169   : > { %v2616_v16 = vpop.f32.mrb[24].mxu0  ;;  %2713 = vmatpush1.bf16.msra.mxu1 %v2712_v14  ;;  %v1084_v14 = vld [vmem:[%s3095_s8 + $0x148] sm:$0xff] }
 0x16a   : > { %v2664_v17 = vpop.f32.mrb[24].mxu1  ;;  %2761 = vmatpush1.bf16.msra.mxu0 %v2760_v15  ;;  %v780_v18 = vpop.f32.mrb[25].mxu0  ;;  %2714 = vmatprep.subr.bf16.mxu1 %v2953_v4  ;;  %v1086_v15 = vld [vmem:[%s3095_s8 + $0x158] sm:$0xff] }
 0x16b   : > { %v940_v19 = vpop.f32.mrb[25].mxu1  ;;  %2762 = vmatprep.subr.bf16.mxu0 %v2953_v4  ;;  %v2715_v20 = vpack.c.bf16 %v2616_v16, %v780_v18  ;;  %v1083_v16 = vld [vmem:[%s3095_s8 + $0x140] sm:$0xff]  ;;  %v1088_v18 = vld [vmem:[%s3095_s8 + $0x168] sm:$0xff] }
 0x16c   : > { %v2763_v21 = vpack.c.bf16 %v2664_v17, %v940_v19  ;;  %v1085_v17 = vld [vmem:[%s3095_s8 + $0x150] sm:$0xff]  ;;  %v1090_v19 = vld [vmem:[%s3095_s8 + $0x178] sm:$0xff] }
 0x16d   : > { %v2619_v22 = vpop.f32.mrb[26].mxu0  ;;  %2716 = vmatpush1.bf16.msra.mxu1 %v2715_v20  ;;  %v1087_v20 = vld [vmem:[%s3095_s8 + $0x160] sm:$0xff] }
 0x16e   : > { %v2667_v23 = vpop.f32.mrb[26].mxu1  ;;  %2764 = vmatpush1.bf16.msra.mxu0 %v2763_v21  ;;  %v790_v24 = vpop.f32.mrb[27].mxu0  ;;  %2717 = vmatprep.subr.bf16.mxu1 %v2953_v4  ;;  %v1089_v21 = vld [vmem:[%s3095_s8 + $0x170] sm:$0xff] }
 0x16f   : > { %v950_v25 = vpop.f32.mrb[27].mxu1  ;;  %2765 = vmatprep.subr.bf16.mxu0 %v2953_v4  ;;  %v2718_v26 = vpack.c.bf16 %v2619_v22, %v790_v24  ;;  %v1092_v22 = vld [vmem:[%s3095_s8 + $0x188] sm:$0xff]  ;;  %v1091_v24 = vld [vmem:[%s3095_s8 + $0x180] sm:$0xff] }
 0x170   : > { %v2766_v27 = vpack.c.bf16 %v2667_v23, %v950_v25  ;;  %v1094_v23 = vld [vmem:[%s3095_s8 + $0x198] sm:$0xff]  ;;  %v1093_v25 = vld [vmem:[%s3095_s8 + $0x190] sm:$0xff] }
 0x171   : > { %v2622_v28 = vpop.f32.mrb[28].mxu0  ;;  %2719 = vmatpush1.bf16.msra.mxu1 %v2718_v26  ;;  %v1096_v26 = vld [vmem:[%s3095_s8 + $0x1a8] sm:$0xff] }
 0x172   : > { %v2670_v29 = vpop.f32.mrb[28].mxu1  ;;  %2767 = vmatpush1.bf16.msra.mxu0 %v2766_v27  ;;  %v800_v30 = vpop.f32.mrb[29].mxu0  ;;  %2720 = vmatprep.subr.bf16.mxu1 %v2953_v4  ;;  %v1098_v27 = vld [vmem:[%s3095_s8 + $0x1b8] sm:$0xff] }
 0x173   : > { %v960_v31 = vpop.f32.mrb[29].mxu1  ;;  %2768 = vmatprep.subr.bf16.mxu0 %v2953_v4  ;;  %v2721_v32 = vpack.c.bf16 %v2622_v28, %v800_v30  ;;  %v1095_v28 = vld [vmem:[%s3095_s8 + $0x1a0] sm:$0xff]  ;;  %v1100_v30 = vld [vmem:[%s3095_s8 + $0x1c8] sm:$0xff] }
 0x174   : > { %v2769_v33 = vpack.c.bf16 %v2670_v29, %v960_v31  ;;  %v1097_v29 = vld [vmem:[%s3095_s8 + $0x1b0] sm:$0xff]  ;;  %v1102_v31 = vld [vmem:[%s3095_s8 + $0x1d8] sm:$0xff] }
 0x175   : > { %v2625_v34 = vpop.f32.mrb[30].mxu0  ;;  %2722 = vmatpush1.bf16.msra.mxu1 %v2721_v32  ;;  %v1099_v32 = vld [vmem:[%s3095_s8 + $0x1c0] sm:$0xff] }
 0x176   : > { %v2673_v35 = vpop.f32.mrb[30].mxu1  ;;  %2770 = vmatpush1.bf16.msra.mxu0 %v2769_v33  ;;  %v810_v36 = vpop.f32.mrb[31].mxu0  ;;  %2723 = vmatprep.subr.bf16.mxu1 %v2953_v4  ;;  %v1101_v33 = vld [vmem:[%s3095_s8 + $0x1d0] sm:$0xff] }
 0x177   : > { %v970_v37 = vpop.f32.mrb[31].mxu1  ;;  %2771 = vmatprep.subr.bf16.mxu0 %v2953_v4  ;;  %v2724_v38 = vpack.c.bf16 %v2625_v34, %v810_v36  ;;  %v1049_v4 = vld [vmem:[%s3095_s8 + $0x30] sm:$0xff]  ;;  %v1104_v34 = vld [vmem:[%s3095_s8 + $0x1e8] sm:$0xff]  ;;  %v1103_v36 = vld [vmem:[%s3095_s8 + $0x1e0] sm:$0xff] }
 0x178   : > { %v2772_v39 = vpack.c.bf16 %v2673_v35, %v970_v37  ;;  %v1106_v35 = vld [vmem:[%s3095_s8 + $0x1f8] sm:$0xff]  ;;  %v1105_v37 = vld [vmem:[%s3095_s8 + $0x1f0] sm:$0xff] }
 0x179   : > { %2725 = vmatpush1.bf16.msra.mxu1 %v2724_v38  ;;  %v1108_v38 = vld [vmem:[%s3095_s8 + $0x208] sm:$0xff] }
 0x17a   : > { %2773 = vmatpush1.bf16.msra.mxu0 %v2772_v39  ;;  %v1110_v39 = vld [vmem:[%s3095_s8 + $0x218] sm:$0xff] }
 0x17c   : > { %1364 = vmatmul.mubr.f32.vlgmr.msra.gmra.mrb[32].mxu1 %v1043_v40  ;;  %v1107_v40 = vld [vmem:[%s3095_s8 + $0x200] sm:$0xff] }
 0x17d   : > { %1749 = vmatmul.mubr.f32.vlgmr.msra.gmra.mrb[32].mxu0 %v1045_v41  ;;  %1368 = vmatprep.mubr.f32.mxu1 %v1048_v42  ;;  %v1109_v41 = vld [vmem:[%s3095_s8 + $0x210] sm:$0xff]  ;;  %v1112_v42 = vld [vmem:[%s3095_s8 + $0x228] sm:$0xff] }
 0x17e   : > { %1753 = vmatprep.mubr.f32.mxu0 %v1050_v43  ;;  %v1114_v43 = vld [vmem:[%s3095_s8 + $0x238] sm:$0xff] }
 0x180   : > { %1369 = vmatmul.mubr.f32.gmra.mrb[34].mxu1 %v1047_v44  ;;  %v1111_v44 = vld [vmem:[%s3095_s8 + $0x220] sm:$0xff] }
 0x181   : > { %1754 = vmatmul.mubr.f32.gmra.mrb[34].mxu0 %v1049_v4  ;;  %1373 = vmatprep.mubr.f32.mxu1 %v1052_v45  ;;  %v1113_v4 = vld [vmem:[%s3095_s8 + $0x230] sm:$0xff]  ;;  %v1116_v45 = vld [vmem:[%s3095_s8 + $0x248] sm:$0xff] }
 0x182   : > { %1758 = vmatprep.mubr.f32.mxu0 %v1054_v46  ;;  %v1118_v46 = vld [vmem:[%s3095_s8 + $0x258] sm:$0xff] }
 0x184   : > { %1374 = vmatmul.mubr.f32.gmra.mrb[36].mxu1 %v1051_v47  ;;  %v1115_v47 = vld [vmem:[%s3095_s8 + $0x240] sm:$0xff] }
 0x185   : > { %1759 = vmatmul.mubr.f32.gmra.mrb[36].mxu0 %v1053_v48  ;;  %1378 = vmatprep.mubr.f32.mxu1 %v1056_v49  ;;  %v1117_v48 = vld [vmem:[%s3095_s8 + $0x250] sm:$0xff]  ;;  %v1120_v49 = vld [vmem:[%s3095_s8 + $0x268] sm:$0xff] }
 0x186   : > { %1763 = vmatprep.mubr.f32.mxu0 %v1058_v50  ;;  %v1122_v50 = vld [vmem:[%s3095_s8 + $0x278] sm:$0xff] }
 0x188   : > { %1379 = vmatmul.mubr.f32.gmra.mrb[38].mxu1 %v1055_v51  ;;  %v1119_v51 = vld [vmem:[%s3095_s8 + $0x260] sm:$0xff] }
 0x189   : > { %1764 = vmatmul.mubr.f32.gmra.mrb[38].mxu0 %v1057_v52  ;;  %1383 = vmatprep.mubr.f32.mxu1 %v1060_v53  ;;  %v1121_v52 = vld [vmem:[%s3095_s8 + $0x270] sm:$0xff]  ;;  %v1124_v53 = vld [vmem:[%s3095_s8 + $0x288] sm:$0xff] }
 0x18a   : > { %1768 = vmatprep.mubr.f32.mxu0 %v1062_v54  ;;  %v1126_v54 = vld [vmem:[%s3095_s8 + $0x298] sm:$0xff] }
 0x18c   : > { %1384 = vmatmul.mubr.f32.gmra.mrb[40].mxu1 %v1059_v55  ;;  %v1123_v55 = vld [vmem:[%s3095_s8 + $0x280] sm:$0xff] }
 0x18d   : > { %1769 = vmatmul.mubr.f32.gmra.mrb[40].mxu0 %v1061_v56  ;;  %1388 = vmatprep.mubr.f32.mxu1 %v1064_v57  ;;  %v1125_v56 = vld [vmem:[%s3095_s8 + $0x290] sm:$0xff]  ;;  %v1128_v57 = vld [vmem:[%s3095_s8 + $0x2a8] sm:$0xff] }
 0x18e   : > { %1773 = vmatprep.mubr.f32.mxu0 %v1066_v58  ;;  %v1130_v58 = vld [vmem:[%s3095_s8 + $0x2b8] sm:$0xff] }
 0x190   : > { %1389 = vmatmul.mubr.f32.gmra.mrb[42].mxu1 %v1063_v59  ;;  %v1127_v59 = vld [vmem:[%s3095_s8 + $0x2a0] sm:$0xff] }
 0x191   : > { %1774 = vmatmul.mubr.f32.gmra.mrb[42].mxu0 %v1065_v60  ;;  %1393 = vmatprep.mubr.f32.mxu1 %v1068_v61  ;;  %v1129_v60 = vld [vmem:[%s3095_s8 + $0x2b0] sm:$0xff]  ;;  %v1132_v61 = vld [vmem:[%s3095_s8 + $0x2c8] sm:$0xff] }
 0x192   : > { %1778 = vmatprep.mubr.f32.mxu0 %v1070_v62  ;;  %v1134_v62 = vld [vmem:[%s3095_s8 + $0x2d8] sm:$0xff] }
 0x194   : > { %1394 = vmatmul.mubr.f32.gmra.mrb[44].mxu1 %v1067_v63  ;;  %v1131_v63 = vld [vmem:[%s3095_s8 + $0x2c0] sm:$0xff] }
 0x195   : > { %1779 = vmatmul.mubr.f32.gmra.mrb[44].mxu0 %v1069_v0  ;;  %1398 = vmatprep.mubr.f32.mxu1 %v1072_v1  ;;  %v1133_v0 = vld [vmem:[%s3095_s8 + $0x2d0] sm:$0xff]  ;;  %v1136_v1 = vld [vmem:[%s3095_s8 + $0x2e8] sm:$0xff] }
 0x196   : > { %1783 = vmatprep.mubr.f32.mxu0 %v1074_v2  ;;  %v1138_v2 = vld [vmem:[%s3095_s8 + $0x2f8] sm:$0xff] }
 0x198   : > { %1399 = vmatmul.mubr.f32.gmra.mrb[46].mxu1 %v1071_v3  ;;  %v1135_v3 = vld [vmem:[%s3095_s8 + $0x2e0] sm:$0xff] }
 0x199   : > { %1784 = vmatmul.mubr.f32.gmra.mrb[46].mxu0 %v1073_v5  ;;  %1403 = vmatprep.mubr.f32.mxu1 %v1076_v6  ;;  %v1137_v5 = vld [vmem:[%s3095_s8 + $0x2f0] sm:$0xff]  ;;  %v1140_v6 = vld [vmem:[%s3095_s8 + $0x308] sm:$0xff] }
 0x19a   : > { %1788 = vmatprep.mubr.f32.mxu0 %v1078_v7  ;;  %v1142_v7 = vld [vmem:[%s3095_s8 + $0x318] sm:$0xff] }
 0x19c   : > { %1404 = vmatmul.mubr.f32.gmra.mrb[48].mxu1 %v1075_v8  ;;  %v1139_v8 = vld [vmem:[%s3095_s8 + $0x300] sm:$0xff] }
 0x19d   : > { %1789 = vmatmul.mubr.f32.gmra.mrb[48].mxu0 %v1077_v9  ;;  %1408 = vmatprep.mubr.f32.mxu1 %v1080_v10  ;;  %v1141_v9 = vld [vmem:[%s3095_s8 + $0x310] sm:$0xff]  ;;  %v1144_v10 = vld [vmem:[%s3095_s8 + $0x328] sm:$0xff] }
 0x19e   : > { %1793 = vmatprep.mubr.f32.mxu0 %v1082_v11  ;;  %v1146_v11 = vld [vmem:[%s3095_s8 + $0x338] sm:$0xff] }
 0x1a0   : > { %1409 = vmatmul.mubr.f32.gmra.mrb[50].mxu1 %v1079_v12  ;;  %v1143_v12 = vld [vmem:[%s3095_s8 + $0x320] sm:$0xff] }
 0x1a1   : > { %1794 = vmatmul.mubr.f32.gmra.mrb[50].mxu0 %v1081_v13  ;;  %1413 = vmatprep.mubr.f32.mxu1 %v1084_v14  ;;  %v1145_v13 = vld [vmem:[%s3095_s8 + $0x330] sm:$0xff]  ;;  %v1148_v14 = vld [vmem:[%s3095_s8 + $0x348] sm:$0xff] }
 0x1a2   : > { %1798 = vmatprep.mubr.f32.mxu0 %v1086_v15  ;;  %v1150_v15 = vld [vmem:[%s3095_s8 + $0x358] sm:$0xff] }
 0x1a4   : > { %1414 = vmatmul.mubr.f32.gmra.mrb[52].mxu1 %v1083_v16  ;;  %v1147_v16 = vld [vmem:[%s3095_s8 + $0x340] sm:$0xff] }
 0x1a5   : > { %1799 = vmatmul.mubr.f32.gmra.mrb[52].mxu0 %v1085_v17  ;;  %1418 = vmatprep.mubr.f32.mxu1 %v1088_v18  ;;  %v1149_v17 = vld [vmem:[%s3095_s8 + $0x350] sm:$0xff]  ;;  %v1152_v18 = vld [vmem:[%s3095_s8 + $0x368] sm:$0xff] }
 0x1a6   : > { %1803 = vmatprep.mubr.f32.mxu0 %v1090_v19  ;;  %v1154_v19 = vld [vmem:[%s3095_s8 + $0x378] sm:$0xff] }
 0x1a8   : > { %1419 = vmatmul.mubr.f32.gmra.mrb[54].mxu1 %v1087_v20  ;;  %v1151_v20 = vld [vmem:[%s3095_s8 + $0x360] sm:$0xff] }
 0x1a9   : > { %1804 = vmatmul.mubr.f32.gmra.mrb[54].mxu0 %v1089_v21  ;;  %1423 = vmatprep.mubr.f32.mxu1 %v1092_v22  ;;  %v1153_v21 = vld [vmem:[%s3095_s8 + $0x370] sm:$0xff]  ;;  %v1156_v22 = vld [vmem:[%s3095_s8 + $0x388] sm:$0xff] }
 0x1aa   : > { %1808 = vmatprep.mubr.f32.mxu0 %v1094_v23  ;;  %v1158_v23 = vld [vmem:[%s3095_s8 + $0x398] sm:$0xff] }
 0x1ac   : > { %1424 = vmatmul.mubr.f32.gmra.mrb[56].mxu1 %v1091_v24  ;;  %v1155_v24 = vld [vmem:[%s3095_s8 + $0x380] sm:$0xff] }
 0x1ad   : > { %1809 = vmatmul.mubr.f32.gmra.mrb[56].mxu0 %v1093_v25  ;;  %1428 = vmatprep.mubr.f32.mxu1 %v1096_v26  ;;  %v1157_v25 = vld [vmem:[%s3095_s8 + $0x390] sm:$0xff]  ;;  %v1160_v26 = vld [vmem:[%s3095_s8 + $0x3a8] sm:$0xff] }
 0x1ae   : > { %1813 = vmatprep.mubr.f32.mxu0 %v1098_v27  ;;  %v1162_v27 = vld [vmem:[%s3095_s8 + $0x3b8] sm:$0xff] }
 0x1b0   : > { %1429 = vmatmul.mubr.f32.gmra.mrb[58].mxu1 %v1095_v28  ;;  %v1159_v28 = vld [vmem:[%s3095_s8 + $0x3a0] sm:$0xff] }
 0x1b1   : > { %1814 = vmatmul.mubr.f32.gmra.mrb[58].mxu0 %v1097_v29  ;;  %1433 = vmatprep.mubr.f32.mxu1 %v1100_v30  ;;  %v1161_v29 = vld [vmem:[%s3095_s8 + $0x3b0] sm:$0xff]  ;;  %v1164_v30 = vld [vmem:[%s3095_s8 + $0x3c8] sm:$0xff] }
 0x1b2   : > { %1818 = vmatprep.mubr.f32.mxu0 %v1102_v31  ;;  %v1166_v31 = vld [vmem:[%s3095_s8 + $0x3d8] sm:$0xff] }
 0x1b4   : > { %1434 = vmatmul.mubr.f32.gmra.mrb[60].mxu1 %v1099_v32  ;;  %v1163_v32 = vld [vmem:[%s3095_s8 + $0x3c0] sm:$0xff] }
 0x1b5   : > { %1819 = vmatmul.mubr.f32.gmra.mrb[60].mxu0 %v1101_v33  ;;  %1438 = vmatprep.mubr.f32.mxu1 %v1104_v34  ;;  %v1165_v33 = vld [vmem:[%s3095_s8 + $0x3d0] sm:$0xff]  ;;  %v1168_v34 = vld [vmem:[%s3095_s8 + $0x3e8] sm:$0xff] }
 0x1b6   : > { %1823 = vmatprep.mubr.f32.mxu0 %v1106_v35  ;;  %v1170_v35 = vld [vmem:[%s3095_s8 + $0x3f8] sm:$0xff] }
 0x1b8   : > { %1439 = vmatmul.mubr.f32.gmra.mrb[62].mxu1 %v1103_v36  ;;  %v1167_v36 = vld [vmem:[%s3095_s8 + $0x3e0] sm:$0xff] }
 0x1b9   : > { %1824 = vmatmul.mubr.f32.gmra.mrb[62].mxu0 %v1105_v37  ;;  %1443 = vmatprep.mubr.f32.mxu1 %v1108_v38  ;;  %v1169_v37 = vld [vmem:[%s3095_s8 + $0x3f0] sm:$0xff]  ;;  %v1172_v38 = vld [vmem:[%s3095_s8 + $0x408] sm:$0xff] }
 0x1ba   : > { %1828 = vmatprep.mubr.f32.mxu0 %v1110_v39  ;;  %v1174_v39 = vld [vmem:[%s3095_s8 + $0x418] sm:$0xff] }
 0x1bc   : > { %1444 = vmatmul.mubr.f32.gmra.mrb[64].mxu1 %v1107_v40  ;;  %v1171_v40 = vld [vmem:[%s3095_s8 + $0x400] sm:$0xff] }
 0x1bd   : > { %1829 = vmatmul.mubr.f32.gmra.mrb[64].mxu0 %v1109_v41  ;;  %1448 = vmatprep.mubr.f32.mxu1 %v1112_v42  ;;  %v1173_v41 = vld [vmem:[%s3095_s8 + $0x410] sm:$0xff]  ;;  %v1176_v42 = vld [vmem:[%s3095_s8 + $0x428] sm:$0xff] }
 0x1be   : > { %1833 = vmatprep.mubr.f32.mxu0 %v1114_v43  ;;  %v1178_v43 = vld [vmem:[%s3095_s8 + $0x438] sm:$0xff] }
 0x1c0   : > { %1449 = vmatmul.mubr.f32.gmra.mrb[66].mxu1 %v1111_v44  ;;  %v1175_v44 = vld [vmem:[%s3095_s8 + $0x420] sm:$0xff] }
 0x1c1   : > { %1834 = vmatmul.mubr.f32.gmra.mrb[66].mxu0 %v1113_v4  ;;  %1453 = vmatprep.mubr.f32.mxu1 %v1116_v45  ;;  %v1177_v4 = vld [vmem:[%s3095_s8 + $0x430] sm:$0xff]  ;;  %v1180_v45 = vld [vmem:[%s3095_s8 + $0x448] sm:$0xff] }
 0x1c2   : > { %1838 = vmatprep.mubr.f32.mxu0 %v1118_v46  ;;  %v1182_v46 = vld [vmem:[%s3095_s8 + $0x458] sm:$0xff] }
 0x1c4   : > { %1454 = vmatmul.mubr.f32.gmra.mrb[68].mxu1 %v1115_v47  ;;  %v1179_v47 = vld [vmem:[%s3095_s8 + $0x440] sm:$0xff] }
 0x1c5   : > { %1839 = vmatmul.mubr.f32.gmra.mrb[68].mxu0 %v1117_v48  ;;  %1458 = vmatprep.mubr.f32.mxu1 %v1120_v49  ;;  %v1181_v48 = vld [vmem:[%s3095_s8 + $0x450] sm:$0xff]  ;;  %v1184_v49 = vld [vmem:[%s3095_s8 + $0x468] sm:$0xff] }
 0x1c6   : > { %1843 = vmatprep.mubr.f32.mxu0 %v1122_v50  ;;  %v1186_v50 = vld [vmem:[%s3095_s8 + $0x478] sm:$0xff] }
 0x1c8   : > { %1459 = vmatmul.mubr.f32.gmra.mrb[70].mxu1 %v1119_v51  ;;  %v1183_v51 = vld [vmem:[%s3095_s8 + $0x460] sm:$0xff] }
 0x1c9   : > { %1844 = vmatmul.mubr.f32.gmra.mrb[70].mxu0 %v1121_v52  ;;  %1463 = vmatprep.mubr.f32.mxu1 %v1124_v53  ;;  %v1185_v52 = vld [vmem:[%s3095_s8 + $0x470] sm:$0xff]  ;;  %v1188_v53 = vld [vmem:[%s3095_s8 + $0x488] sm:$0xff] }
 0x1ca   : > { %1848 = vmatprep.mubr.f32.mxu0 %v1126_v54  ;;  %v1190_v54 = vld [vmem:[%s3095_s8 + $0x498] sm:$0xff] }
 0x1cc   : > { %1464 = vmatmul.mubr.f32.gmra.mrb[72].mxu1 %v1123_v55  ;;  %v1187_v55 = vld [vmem:[%s3095_s8 + $0x480] sm:$0xff] }
 0x1cd   : > { %1849 = vmatmul.mubr.f32.gmra.mrb[72].mxu0 %v1125_v56  ;;  %1468 = vmatprep.mubr.f32.mxu1 %v1128_v57  ;;  %v1189_v56 = vld [vmem:[%s3095_s8 + $0x490] sm:$0xff]  ;;  %v1192_v57 = vld [vmem:[%s3095_s8 + $0x4a8] sm:$0xff] }
 0x1ce   : > { %1853 = vmatprep.mubr.f32.mxu0 %v1130_v58  ;;  %v1194_v58 = vld [vmem:[%s3095_s8 + $0x4b8] sm:$0xff] }
 0x1d0   : > { %1469 = vmatmul.mubr.f32.gmra.mrb[74].mxu1 %v1127_v59  ;;  %v1191_v59 = vld [vmem:[%s3095_s8 + $0x4a0] sm:$0xff] }
 0x1d1   : > { %1854 = vmatmul.mubr.f32.gmra.mrb[74].mxu0 %v1129_v60  ;;  %1473 = vmatprep.mubr.f32.mxu1 %v1132_v61  ;;  %v1193_v60 = vld [vmem:[%s3095_s8 + $0x4b0] sm:$0xff]  ;;  %v1196_v61 = vld [vmem:[%s3095_s8 + $0x4c8] sm:$0xff] }
 0x1d2   : > { %1858 = vmatprep.mubr.f32.mxu0 %v1134_v62  ;;  %v1198_v62 = vld [vmem:[%s3095_s8 + $0x4d8] sm:$0xff] }
 0x1d4   : > { %1474 = vmatmul.mubr.f32.gmra.mrb[76].mxu1 %v1131_v63  ;;  %v1195_v63 = vld [vmem:[%s3095_s8 + $0x4c0] sm:$0xff] }
 0x1d5   : > { %1859 = vmatmul.mubr.f32.gmra.mrb[76].mxu0 %v1133_v0  ;;  %1478 = vmatprep.mubr.f32.mxu1 %v1136_v1  ;;  %v1197_v0 = vld [vmem:[%s3095_s8 + $0x4d0] sm:$0xff]  ;;  %v1200_v1 = vld [vmem:[%s3095_s8 + $0x4e8] sm:$0xff] }
 0x1d6   : > { %1863 = vmatprep.mubr.f32.mxu0 %v1138_v2  ;;  %v1202_v2 = vld [vmem:[%s3095_s8 + $0x4f8] sm:$0xff] }
 0x1d8   : > { %1479 = vmatmul.mubr.f32.gmra.mrb[78].mxu1 %v1135_v3  ;;  %v1199_v3 = vld [vmem:[%s3095_s8 + $0x4e0] sm:$0xff] }
 0x1d9   : > { %1864 = vmatmul.mubr.f32.gmra.mrb[78].mxu0 %v1137_v5  ;;  %1483 = vmatprep.mubr.f32.mxu1 %v1140_v6  ;;  %v1201_v5 = vld [vmem:[%s3095_s8 + $0x4f0] sm:$0xff]  ;;  %v1204_v6 = vld [vmem:[%s3095_s8 + $0x508] sm:$0xff] }
 0x1da   : > { %1868 = vmatprep.mubr.f32.mxu0 %v1142_v7  ;;  %v1206_v7 = vld [vmem:[%s3095_s8 + $0x518] sm:$0xff] }
 0x1dc   : > { %1484 = vmatmul.mubr.f32.gmra.mrb[80].mxu1 %v1139_v8  ;;  %v1203_v8 = vld [vmem:[%s3095_s8 + $0x500] sm:$0xff] }
 0x1dd   : > { %1869 = vmatmul.mubr.f32.gmra.mrb[80].mxu0 %v1141_v9  ;;  %1488 = vmatprep.mubr.f32.mxu1 %v1144_v10  ;;  %v1205_v9 = vld [vmem:[%s3095_s8 + $0x510] sm:$0xff]  ;;  %v1208_v10 = vld [vmem:[%s3095_s8 + $0x528] sm:$0xff] }
 0x1de   : > { %1873 = vmatprep.mubr.f32.mxu0 %v1146_v11  ;;  %v1210_v11 = vld [vmem:[%s3095_s8 + $0x538] sm:$0xff] }
 0x1e0   : > { %1489 = vmatmul.mubr.f32.gmra.mrb[82].mxu1 %v1143_v12  ;;  %v1207_v12 = vld [vmem:[%s3095_s8 + $0x520] sm:$0xff] }
 0x1e1   : > { %1874 = vmatmul.mubr.f32.gmra.mrb[82].mxu0 %v1145_v13  ;;  %1493 = vmatprep.mubr.f32.mxu1 %v1148_v14  ;;  %v1209_v13 = vld [vmem:[%s3095_s8 + $0x530] sm:$0xff]  ;;  %v1212_v14 = vld [vmem:[%s3095_s8 + $0x548] sm:$0xff] }
 0x1e2   : > { %1878 = vmatprep.mubr.f32.mxu0 %v1150_v15  ;;  %v1214_v15 = vld [vmem:[%s3095_s8 + $0x558] sm:$0xff] }
 0x1e4   : > { %1494 = vmatmul.mubr.f32.gmra.mrb[84].mxu1 %v1147_v16  ;;  %v1211_v16 = vld [vmem:[%s3095_s8 + $0x540] sm:$0xff] }
 0x1e5   : > { %1879 = vmatmul.mubr.f32.gmra.mrb[84].mxu0 %v1149_v17  ;;  %1498 = vmatprep.mubr.f32.mxu1 %v1152_v18  ;;  %v1213_v17 = vld [vmem:[%s3095_s8 + $0x550] sm:$0xff]  ;;  %v1216_v18 = vld [vmem:[%s3095_s8 + $0x568] sm:$0xff] }
 0x1e6   : > { %1883 = vmatprep.mubr.f32.mxu0 %v1154_v19  ;;  %v1218_v19 = vld [vmem:[%s3095_s8 + $0x578] sm:$0xff] }
 0x1e8   : > { %1499 = vmatmul.mubr.f32.gmra.mrb[86].mxu1 %v1151_v20  ;;  %v1215_v20 = vld [vmem:[%s3095_s8 + $0x560] sm:$0xff] }
 0x1e9   : > { %1884 = vmatmul.mubr.f32.gmra.mrb[86].mxu0 %v1153_v21  ;;  %1503 = vmatprep.mubr.f32.mxu1 %v1156_v22  ;;  %v1217_v21 = vld [vmem:[%s3095_s8 + $0x570] sm:$0xff]  ;;  %v1220_v22 = vld [vmem:[%s3095_s8 + $0x588] sm:$0xff] }
 0x1ea   : > { %1888 = vmatprep.mubr.f32.mxu0 %v1158_v23  ;;  %v1222_v23 = vld [vmem:[%s3095_s8 + $0x598] sm:$0xff] }
 0x1ec   : > { %1504 = vmatmul.mubr.f32.gmra.mrb[88].mxu1 %v1155_v24  ;;  %v1219_v24 = vld [vmem:[%s3095_s8 + $0x580] sm:$0xff] }
 0x1ed   : > { %1889 = vmatmul.mubr.f32.gmra.mrb[88].mxu0 %v1157_v25  ;;  %1508 = vmatprep.mubr.f32.mxu1 %v1160_v26  ;;  %v1221_v25 = vld [vmem:[%s3095_s8 + $0x590] sm:$0xff]  ;;  %v1224_v26 = vld [vmem:[%s3095_s8 + $0x5a8] sm:$0xff] }
 0x1ee   : > { %1893 = vmatprep.mubr.f32.mxu0 %v1162_v27  ;;  %v1226_v27 = vld [vmem:[%s3095_s8 + $0x5b8] sm:$0xff] }
 0x1f0   : > { %1509 = vmatmul.mubr.f32.gmra.mrb[90].mxu1 %v1159_v28  ;;  %v1223_v28 = vld [vmem:[%s3095_s8 + $0x5a0] sm:$0xff] }
 0x1f1   : > { %1894 = vmatmul.mubr.f32.gmra.mrb[90].mxu0 %v1161_v29  ;;  %1513 = vmatprep.mubr.f32.mxu1 %v1164_v30  ;;  %v1225_v29 = vld [vmem:[%s3095_s8 + $0x5b0] sm:$0xff]  ;;  %v1228_v30 = vld [vmem:[%s3095_s8 + $0x5c8] sm:$0xff] }
 0x1f2   : > { %1898 = vmatprep.mubr.f32.mxu0 %v1166_v31  ;;  %v1230_v31 = vld [vmem:[%s3095_s8 + $0x5d8] sm:$0xff] }
 0x1f4   : > { %1514 = vmatmul.mubr.f32.gmra.mrb[92].mxu1 %v1163_v32  ;;  %v1227_v32 = vld [vmem:[%s3095_s8 + $0x5c0] sm:$0xff] }
 0x1f5   : > { %1899 = vmatmul.mubr.f32.gmra.mrb[92].mxu0 %v1165_v33  ;;  %1518 = vmatprep.mubr.f32.mxu1 %v1168_v34  ;;  %v1229_v33 = vld [vmem:[%s3095_s8 + $0x5d0] sm:$0xff]  ;;  %v1232_v34 = vld [vmem:[%s3095_s8 + $0x5e8] sm:$0xff] }
 0x1f6   : > { %1903 = vmatprep.mubr.f32.mxu0 %v1170_v35  ;;  %v1234_v35 = vld [vmem:[%s3095_s8 + $0x5f8] sm:$0xff] }
 0x1f8   : > { %1519 = vmatmul.mubr.f32.gmra.mrb[94].mxu1 %v1167_v36  ;;  %v1231_v36 = vld [vmem:[%s3095_s8 + $0x5e0] sm:$0xff] }
 0x1f9   : > { %1904 = vmatmul.mubr.f32.gmra.mrb[94].mxu0 %v1169_v37  ;;  %1523 = vmatprep.mubr.f32.mxu1 %v1172_v38  ;;  %v1233_v37 = vld [vmem:[%s3095_s8 + $0x5f0] sm:$0xff]  ;;  %v1236_v38 = vld [vmem:[%s3095_s8 + $0x608] sm:$0xff] }
 0x1fa   : > { %1908 = vmatprep.mubr.f32.mxu0 %v1174_v39  ;;  %v1238_v39 = vld [vmem:[%s3095_s8 + $0x618] sm:$0xff] }
 0x1fc   : > { %1524 = vmatmul.mubr.f32.gmra.mrb[96].mxu1 %v1171_v40  ;;  %v1235_v40 = vld [vmem:[%s3095_s8 + $0x600] sm:$0xff] }
 0x1fd   : > { %1909 = vmatmul.mubr.f32.gmra.mrb[96].mxu0 %v1173_v41  ;;  %1528 = vmatprep.mubr.f32.mxu1 %v1176_v42  ;;  %v1237_v41 = vld [vmem:[%s3095_s8 + $0x610] sm:$0xff]  ;;  %v1240_v42 = vld [vmem:[%s3095_s8 + $0x628] sm:$0xff] }
 0x1fe   : > { %1913 = vmatprep.mubr.f32.mxu0 %v1178_v43  ;;  %v1242_v43 = vld [vmem:[%s3095_s8 + $0x638] sm:$0xff] }
 0x200   : > { %1529 = vmatmul.mubr.f32.gmra.mrb[98].mxu1 %v1175_v44  ;;  %v1239_v44 = vld [vmem:[%s3095_s8 + $0x620] sm:$0xff] }
 0x201   : > { %1914 = vmatmul.mubr.f32.gmra.mrb[98].mxu0 %v1177_v4  ;;  %1533 = vmatprep.mubr.f32.mxu1 %v1180_v45  ;;  %v1241_v4 = vld [vmem:[%s3095_s8 + $0x630] sm:$0xff]  ;;  %v1244_v45 = vld [vmem:[%s3095_s8 + $0x648] sm:$0xff] }
 0x202   : > { %1918 = vmatprep.mubr.f32.mxu0 %v1182_v46  ;;  %v1246_v46 = vld [vmem:[%s3095_s8 + $0x658] sm:$0xff] }
 0x204   : > { %1534 = vmatmul.mubr.f32.gmra.mrb[100].mxu1 %v1179_v47  ;;  %v1243_v47 = vld [vmem:[%s3095_s8 + $0x640] sm:$0xff] }
 0x205   : > { %1919 = vmatmul.mubr.f32.gmra.mrb[100].mxu0 %v1181_v48  ;;  %1538 = vmatprep.mubr.f32.mxu1 %v1184_v49  ;;  %v1245_v48 = vld [vmem:[%s3095_s8 + $0x650] sm:$0xff]  ;;  %v1248_v49 = vld [vmem:[%s3095_s8 + $0x668] sm:$0xff] }
 0x206   : > { %1923 = vmatprep.mubr.f32.mxu0 %v1186_v50  ;;  %v1250_v50 = vld [vmem:[%s3095_s8 + $0x678] sm:$0xff] }
 0x208   : > { %1539 = vmatmul.mubr.f32.gmra.mrb[102].mxu1 %v1183_v51  ;;  %v1247_v51 = vld [vmem:[%s3095_s8 + $0x660] sm:$0xff] }
 0x209   : > { %1924 = vmatmul.mubr.f32.gmra.mrb[102].mxu0 %v1185_v52  ;;  %1543 = vmatprep.mubr.f32.mxu1 %v1188_v53  ;;  %v1249_v52 = vld [vmem:[%s3095_s8 + $0x670] sm:$0xff]  ;;  %v1252_v53 = vld [vmem:[%s3095_s8 + $0x688] sm:$0xff] }
 0x20a   : > { %1928 = vmatprep.mubr.f32.mxu0 %v1190_v54  ;;  %v1254_v54 = vld [vmem:[%s3095_s8 + $0x698] sm:$0xff] }
 0x20c   : > { %1544 = vmatmul.mubr.f32.gmra.mrb[104].mxu1 %v1187_v55  ;;  %v1251_v55 = vld [vmem:[%s3095_s8 + $0x680] sm:$0xff] }
 0x20d   : > { %1929 = vmatmul.mubr.f32.gmra.mrb[104].mxu0 %v1189_v56  ;;  %1548 = vmatprep.mubr.f32.mxu1 %v1192_v57  ;;  %v1253_v56 = vld [vmem:[%s3095_s8 + $0x690] sm:$0xff]  ;;  %v1256_v57 = vld [vmem:[%s3095_s8 + $0x6a8] sm:$0xff] }
 0x20e   : > { %1933 = vmatprep.mubr.f32.mxu0 %v1194_v58  ;;  %v1258_v58 = vld [vmem:[%s3095_s8 + $0x6b8] sm:$0xff] }
 0x210   : > { %1549 = vmatmul.mubr.f32.gmra.mrb[106].mxu1 %v1191_v59  ;;  %v1255_v59 = vld [vmem:[%s3095_s8 + $0x6a0] sm:$0xff] }
 0x211   : > { %1934 = vmatmul.mubr.f32.gmra.mrb[106].mxu0 %v1193_v60  ;;  %1553 = vmatprep.mubr.f32.mxu1 %v1196_v61  ;;  %v1257_v60 = vld [vmem:[%s3095_s8 + $0x6b0] sm:$0xff]  ;;  %v1260_v61 = vld [vmem:[%s3095_s8 + $0x6c8] sm:$0xff] }
 0x212   : > { %1938 = vmatprep.mubr.f32.mxu0 %v1198_v62  ;;  %v1262_v62 = vld [vmem:[%s3095_s8 + $0x6d8] sm:$0xff] }
 0x214   : > { %1554 = vmatmul.mubr.f32.gmra.mrb[108].mxu1 %v1195_v63 }
 0x215   : > { %1939 = vmatmul.mubr.f32.gmra.mrb[108].mxu0 %v1197_v0  ;;  %1558 = vmatprep.mubr.f32.mxu1 %v1200_v1  ;;  %v979_v0 = vld [vmem:[#allocation2] sm:$0xff] }
 0x216   : > { %1943 = vmatprep.mubr.f32.mxu0 %v1202_v2 }
 0x218   : > { %1559 = vmatmul.mubr.f32.gmra.mrb[110].mxu1 %v1199_v3 }
 0x219   : > { %1944 = vmatmul.mubr.f32.gmra.mrb[110].mxu0 %v1201_v5  ;;  %1563 = vmatprep.mubr.f32.mxu1 %v1204_v6  ;;  %v1259_v6 = vld [vmem:[%s3095_s8 + $0x6c0] sm:$0xff] }
 0x21a   : > { %1948 = vmatprep.mubr.f32.mxu0 %v1206_v7  ;;  %v1261_v7 = vld [vmem:[%s3095_s8 + $0x6d0] sm:$0xff] }
 0x21c   : > { %1564 = vmatmul.mubr.f32.gmra.mrb[112].mxu1 %v1203_v8 }
 0x21d   : > { %1949 = vmatmul.mubr.f32.gmra.mrb[112].mxu0 %v1205_v9  ;;  %1568 = vmatprep.mubr.f32.mxu1 %v1208_v10  ;;  %v1264_v9 = vld [vmem:[%s3095_s8 + $0x6e8] sm:$0xff]  ;;  %v1266_v10 = vld [vmem:[%s3095_s8 + $0x6f8] sm:$0xff] }
 0x21e   : > { %1953 = vmatprep.mubr.f32.mxu0 %v1210_v11 }
 0x220   : > { %1569 = vmatmul.mubr.f32.gmra.mrb[114].mxu1 %v1207_v12  ;;  %v980_v12 = vld [vmem:[#allocation2 + $0x8] sm:$0xff] }
 0x221   : > { %1954 = vmatmul.mubr.f32.gmra.mrb[114].mxu0 %v1209_v13  ;;  %1573 = vmatprep.mubr.f32.mxu1 %v1212_v14 }
 0x222   : > { %1958 = vmatprep.mubr.f32.mxu0 %v1214_v15 }
 0x224   : > { %1574 = vmatmul.mubr.f32.gmra.mrb[116].mxu1 %v1211_v16 }
 0x225   : > { %1959 = vmatmul.mubr.f32.gmra.mrb[116].mxu0 %v1213_v17  ;;  %1578 = vmatprep.mubr.f32.mxu1 %v1216_v18  ;;  %v1263_v17 = vld [vmem:[%s3095_s8 + $0x6e0] sm:$0xff]  ;;  %v1265_v18 = vld [vmem:[%s3095_s8 + $0x6f0] sm:$0xff] }
 0x226   : > { %1963 = vmatprep.mubr.f32.mxu0 %v1218_v19 }
 0x228   : > { %1579 = vmatmul.mubr.f32.gmra.mrb[118].mxu1 %v1215_v20  ;;  %v1268_v20 = vld [vmem:[%s3095_s8 + $0x708] sm:$0xff] }
 0x229   : > { %1964 = vmatmul.mubr.f32.gmra.mrb[118].mxu0 %v1217_v21  ;;  %1583 = vmatprep.mubr.f32.mxu1 %v1220_v22  ;;  %v1270_v21 = vld [vmem:[%s3095_s8 + $0x718] sm:$0xff] }
 0x22a   : > { %1968 = vmatprep.mubr.f32.mxu0 %v1222_v23  ;;  %v981_v23 = vld [vmem:[#allocation2 + $0x10] sm:$0xff] }
 0x22c   : > { %1584 = vmatmul.mubr.f32.gmra.mrb[120].mxu1 %v1219_v24 }
 0x22d   : > { %1969 = vmatmul.mubr.f32.gmra.mrb[120].mxu0 %v1221_v25  ;;  %1588 = vmatprep.mubr.f32.mxu1 %v1224_v26 }
 0x22e   : > { %1973 = vmatprep.mubr.f32.mxu0 %v1226_v27 }
 0x230   : > { %1589 = vmatmul.mubr.f32.gmra.mrb[122].mxu1 %v1223_v28  ;;  %v1267_v28 = vld [vmem:[%s3095_s8 + $0x700] sm:$0xff] }
 0x231   : > { %1974 = vmatmul.mubr.f32.gmra.mrb[122].mxu0 %v1225_v29  ;;  %1593 = vmatprep.mubr.f32.mxu1 %v1228_v30  ;;  %v1269_v29 = vld [vmem:[%s3095_s8 + $0x710] sm:$0xff] }
 0x232   : > { %1978 = vmatprep.mubr.f32.mxu0 %v1230_v31  ;;  %v1272_v31 = vld [vmem:[%s3095_s8 + $0x728] sm:$0xff] }
 0x234   : > { %1594 = vmatmul.mubr.f32.gmra.mrb[124].mxu1 %v1227_v32  ;;  %v1274_v32 = vld [vmem:[%s3095_s8 + $0x738] sm:$0xff] }
 0x235   : > { %1979 = vmatmul.mubr.f32.gmra.mrb[124].mxu0 %v1229_v33  ;;  %1598 = vmatprep.mubr.f32.mxu1 %v1232_v34  ;;  %v982_v34 = vld [vmem:[#allocation2 + $0x18] sm:$0xff] }
 0x236   : > { %1983 = vmatprep.mubr.f32.mxu0 %v1234_v35 }
 0x238   : > { %1599 = vmatmul.mubr.f32.gmra.mrb[126].mxu1 %v1231_v36 }
 0x239   : > { %1984 = vmatmul.mubr.f32.gmra.mrb[126].mxu0 %v1233_v37  ;;  %1603 = vmatprep.mubr.f32.mxu1 %v1236_v38 }
 0x23a   : > { %1988 = vmatprep.mubr.f32.mxu0 %v1238_v39  ;;  %v1271_v39 = vld [vmem:[%s3095_s8 + $0x720] sm:$0xff] }
 0x23c   : > { %1604 = vmatmul.mubr.f32.gmra.mrb[128].mxu1 %v1235_v40  ;;  %v1273_v40 = vld [vmem:[%s3095_s8 + $0x730] sm:$0xff] }
 0x23d   : > { %1989 = vmatmul.mubr.f32.gmra.mrb[128].mxu0 %v1237_v41  ;;  %1608 = vmatprep.mubr.f32.mxu1 %v1240_v42  ;;  %v1276_v42 = vld [vmem:[%s3095_s8 + $0x748] sm:$0xff] }
 0x23e   : > { %1993 = vmatprep.mubr.f32.mxu0 %v1242_v43  ;;  %v1278_v43 = vld [vmem:[%s3095_s8 + $0x758] sm:$0xff] }
 0x240   : > { %1609 = vmatmul.mubr.f32.gmra.mrb[130].mxu1 %v1239_v44 }
 0x241   : > { %1994 = vmatmul.mubr.f32.gmra.mrb[130].mxu0 %v1241_v4  ;;  %1613 = vmatprep.mubr.f32.mxu1 %v1244_v45  ;;  %v983_v4 = vld [vmem:[#allocation2 + $0x20] sm:$0xff] }
 0x242   : > { %1998 = vmatprep.mubr.f32.mxu0 %v1246_v46 }
 0x244   : > { %1614 = vmatmul.mubr.f32.gmra.mrb[132].mxu1 %v1243_v47 }
 0x245   : > { %1999 = vmatmul.mubr.f32.gmra.mrb[132].mxu0 %v1245_v48  ;;  %1618 = vmatprep.mubr.f32.mxu1 %v1248_v49  ;;  %v1275_v49 = vld [vmem:[%s3095_s8 + $0x740] sm:$0xff] }
 0x246   : > { %2003 = vmatprep.mubr.f32.mxu0 %v1250_v50  ;;  %v1277_v50 = vld [vmem:[%s3095_s8 + $0x750] sm:$0xff] }
 0x248   : > { %1619 = vmatmul.mubr.f32.gmra.mrb[134].mxu1 %v1247_v51 }
 0x249   : > { %2004 = vmatmul.mubr.f32.gmra.mrb[134].mxu0 %v1249_v52  ;;  %1623 = vmatprep.mubr.f32.mxu1 %v1252_v53  ;;  %v1280_v52 = vld [vmem:[%s3095_s8 + $0x768] sm:$0xff]  ;;  %v1282_v53 = vld [vmem:[%s3095_s8 + $0x778] sm:$0xff] }
 0x24a   : > { %2008 = vmatprep.mubr.f32.mxu0 %v1254_v54 }
 0x24c   : > { %1624 = vmatmul.mubr.f32.gmra.mrb[136].mxu1 %v1251_v55  ;;  %v984_v55 = vld [vmem:[#allocation2 + $0x28] sm:$0xff] }
 0x24d   : > { %2009 = vmatmul.mubr.f32.gmra.mrb[136].mxu0 %v1253_v56  ;;  %1628 = vmatprep.mubr.f32.mxu1 %v1256_v57 }
 0x24e   : > { %2013 = vmatprep.mubr.f32.mxu0 %v1258_v58 }
 0x24f   : > { %v1365_v63 = vpop.f32.mrb[32].mxu1 }
 0x250   : > { %v1750_v1 = vpop.f32.mrb[32].mxu0  ;;  %v1367_v3 = vpop.f32.mrb[33].mxu1  ;;  %1629 = vmatmul.mubr.f32.gmra.mrb[138].mxu1 %v1255_v59 }
 0x251   : > { %v1751_v2 = vadd.f32 %v1750_v1, %v1365_v63  ;;  %v1752_v5 = vpop.f32.mrb[33].mxu0  ;;  %2014 = vmatmul.mubr.f32.gmra.mrb[138].mxu0 %v1257_v60  ;;  %1633 = vmatprep.mubr.f32.mxu1 %v1260_v61  ;;  %v1279_v60 = vld [vmem:[%s3095_s8 + $0x760] sm:$0xff]  ;;  %v1281_v61 = vld [vmem:[%s3095_s8 + $0x770] sm:$0xff]  ;;  %v1284_v63 = vld [vmem:[%s3095_s8 + $0x788] sm:$0xff] }
 0x252   : > { %2018 = vmatprep.mubr.f32.mxu0 %v1262_v62 }
 0x253   : > { %v2069_v8 = vadd.f32 %v1751_v2, %v979_v0  ;;  %v1370_v11 = vpop.f32.mrb[34].mxu1  ;;  %v1286_v0 = vld [vmem:[%s3095_s8 + $0x798] sm:$0xff]  ;;  %v985_v2 = vld [vmem:[#allocation2 + $0x30] sm:$0xff] }
 0x254   : > { %v1755_v13 = vpop.f32.mrb[34].mxu0  ;;  %v1372_v15 = vpop.f32.mrb[35].mxu1  ;;  %1634 = vmatmul.mubr.f32.gmra.mrb[140].mxu1 %v1259_v6 }
 0x255   : > { %2133 = vst [vmem:[#allocation2] sm:$0xff] %v2069_v8  ;;  %v1756_v14 = vadd.f32 %v1755_v13, %v1370_v11  ;;  %v1757_v16 = vpop.f32.mrb[35].mxu0  ;;  %2019 = vmatmul.mubr.f32.gmra.mrb[140].mxu0 %v1261_v7  ;;  %1638 = vmatprep.mubr.f32.mxu1 %v1264_v9  ;;  %v1283_v8 = vld [vmem:[%s3095_s8 + $0x780] sm:$0xff]  ;;  %v1285_v9 = vld [vmem:[%s3095_s8 + $0x790] sm:$0xff]  ;;  %v1288_v11 = vld [vmem:[%s3095_s8 + $0x7a8] sm:$0xff] }
 0x256   : > { %2023 = vmatprep.mubr.f32.mxu0 %v1266_v10 }
 0x257   : > { %v2070_v19 = vadd.f32 %v1756_v14, %v980_v12  ;;  %v1375_v22 = vpop.f32.mrb[36].mxu1  ;;  %v1290_v12 = vld [vmem:[%s3095_s8 + $0x7b8] sm:$0xff] }
 0x258   : > { %v1760_v24 = vpop.f32.mrb[36].mxu0  ;;  %v1377_v26 = vpop.f32.mrb[37].mxu1  ;;  %1639 = vmatmul.mubr.f32.gmra.mrb[142].mxu1 %v1263_v17  ;;  %v986_v14 = vld [vmem:[#allocation2 + $0x38] sm:$0xff] }
 0x259   : > { %2134 = vst [vmem:[#allocation2 + $0x8] sm:$0xff] %v2070_v19  ;;  %v1761_v25 = vadd.f32 %v1760_v24, %v1375_v22  ;;  %v1762_v27 = vpop.f32.mrb[37].mxu0  ;;  %2024 = vmatmul.mubr.f32.gmra.mrb[142].mxu0 %v1265_v18  ;;  %1643 = vmatprep.mubr.f32.mxu1 %v1268_v20  ;;  %v1287_v19 = vld [vmem:[%s3095_s8 + $0x7a0] sm:$0xff]  ;;  %v1289_v20 = vld [vmem:[%s3095_s8 + $0x7b0] sm:$0xff]  ;;  %v1292_v22 = vld [vmem:[%s3095_s8 + $0x7c8] sm:$0xff] }
 0x25a   : > { %2028 = vmatprep.mubr.f32.mxu0 %v1270_v21 }
 0x25b   : > { %v2071_v30 = vadd.f32 %v1761_v25, %v981_v23  ;;  %v1380_v33 = vpop.f32.mrb[38].mxu1  ;;  %v1294_v23 = vld [vmem:[%s3095_s8 + $0x7d8] sm:$0xff]  ;;  %v987_v25 = vld [vmem:[#allocation2 + $0x40] sm:$0xff] }
 0x25c   : > { %v1765_v35 = vpop.f32.mrb[38].mxu0  ;;  %v1382_v37 = vpop.f32.mrb[39].mxu1  ;;  %1644 = vmatmul.mubr.f32.gmra.mrb[144].mxu1 %v1267_v28 }
 0x25d   : > { %2135 = vst [vmem:[#allocation2 + $0x10] sm:$0xff] %v2071_v30  ;;  %v1766_v36 = vadd.f32 %v1765_v35, %v1380_v33  ;;  %v1767_v38 = vpop.f32.mrb[39].mxu0  ;;  %2029 = vmatmul.mubr.f32.gmra.mrb[144].mxu0 %v1269_v29  ;;  %1648 = vmatprep.mubr.f32.mxu1 %v1272_v31  ;;  %v1291_v30 = vld [vmem:[%s3095_s8 + $0x7c0] sm:$0xff]  ;;  %v1293_v31 = vld [vmem:[%s3095_s8 + $0x7d0] sm:$0xff]  ;;  %v1296_v33 = vld [vmem:[%s3095_s8 + $0x7e8] sm:$0xff] }
 0x25e   : > { %2033 = vmatprep.mubr.f32.mxu0 %v1274_v32 }
 0x25f   : > { %v2072_v41 = vadd.f32 %v1766_v36, %v982_v34  ;;  %v1385_v44 = vpop.f32.mrb[40].mxu1  ;;  %v1298_v34 = vld [vmem:[%s3095_s8 + $0x7f8] sm:$0xff]  ;;  %v988_v36 = vld [vmem:[#allocation2 + $0x48] sm:$0xff] }
 0x260   : > { %v1770_v45 = vpop.f32.mrb[40].mxu0  ;;  %v1387_v47 = vpop.f32.mrb[41].mxu1  ;;  %1649 = vmatmul.mubr.f32.gmra.mrb[146].mxu1 %v1271_v39 }
 0x261   : > { %2136 = vst [vmem:[#allocation2 + $0x18] sm:$0xff] %v2072_v41  ;;  %v1771_v46 = vadd.f32 %v1770_v45, %v1385_v44  ;;  %v1772_v48 = vpop.f32.mrb[41].mxu0  ;;  %2034 = vmatmul.mubr.f32.gmra.mrb[146].mxu0 %v1273_v40  ;;  %1653 = vmatprep.mubr.f32.mxu1 %v1276_v42  ;;  %v1295_v41 = vld [vmem:[%s3095_s8 + $0x7e0] sm:$0xff]  ;;  %v1297_v42 = vld [vmem:[%s3095_s8 + $0x7f0] sm:$0xff] }
 0x262   : > { %2038 = vmatprep.mubr.f32.mxu0 %v1278_v43 }
 0x263   : > { %v2073_v51 = vadd.f32 %v1771_v46, %v983_v4  ;;  %v1390_v54 = vpop.f32.mrb[42].mxu1  ;;  %v989_v4 = vld [vmem:[#allocation2 + $0x50] sm:$0xff] }
 0x264   : > { %v1775_v56 = vpop.f32.mrb[42].mxu0  ;;  %v1392_v58 = vpop.f32.mrb[43].mxu1  ;;  %1654 = vmatmul.mubr.f32.gmra.mrb[148].mxu1 %v1275_v49 }
 0x265   : > { %2137 = vst [vmem:[#allocation2 + $0x20] sm:$0xff] %v2073_v51  ;;  %v1776_v57 = vadd.f32 %v1775_v56, %v1390_v54  ;;  %v1777_v59 = vpop.f32.mrb[43].mxu0  ;;  %2039 = vmatmul.mubr.f32.gmra.mrb[148].mxu0 %v1277_v50  ;;  %1658 = vmatprep.mubr.f32.mxu1 %v1280_v52  ;;  %v990_v51 = vld [vmem:[#allocation2 + $0x58] sm:$0xff]  ;;  %v991_v58 = vld [vmem:[#allocation2 + $0x60] sm:$0xff] }
 0x266   : > { %2043 = vmatprep.mubr.f32.mxu0 %v1282_v53 }
 0x267   : > { %v2074_v62 = vadd.f32 %v1776_v57, %v984_v55  ;;  %v1395_v1 = vpop.f32.mrb[44].mxu1 }
 0x268   : > { %v1780_v3 = vpop.f32.mrb[44].mxu0  ;;  %v1397_v6 = vpop.f32.mrb[45].mxu1  ;;  %1659 = vmatmul.mubr.f32.gmra.mrb[150].mxu1 %v1279_v60 }
 0x269   : > { %2138 = vst [vmem:[#allocation2 + $0x28] sm:$0xff] %v2074_v62  ;;  %v1781_v5 = vadd.f32 %v1780_v3, %v1395_v1  ;;  %v1782_v7 = vpop.f32.mrb[45].mxu0  ;;  %2044 = vmatmul.mubr.f32.gmra.mrb[150].mxu0 %v1281_v61  ;;  %1663 = vmatprep.mubr.f32.mxu1 %v1284_v63  ;;  %v992_v1 = vld [vmem:[#allocation2 + $0x68] sm:$0xff] }
 0x26a   : > { %2048 = vmatprep.mubr.f32.mxu0 %v1286_v0 }
 0x26b   : > { %v2075_v10 = vadd.f32 %v1781_v5, %v985_v2  ;;  %v1400_v13 = vpop.f32.mrb[46].mxu1 }
 0x26c   : > { %v1785_v15 = vpop.f32.mrb[46].mxu0  ;;  %v1402_v17 = vpop.f32.mrb[47].mxu1  ;;  %1664 = vmatmul.mubr.f32.gmra.mrb[152].mxu1 %v1283_v8 }
 0x26d   : > { %2139 = vst [vmem:[#allocation2 + $0x30] sm:$0xff] %v2075_v10  ;;  %v1786_v16 = vadd.f32 %v1785_v15, %v1400_v13  ;;  %v1787_v18 = vpop.f32.mrb[47].mxu0  ;;  %2049 = vmatmul.mubr.f32.gmra.mrb[152].mxu0 %v1285_v9  ;;  %1668 = vmatprep.mubr.f32.mxu1 %v1288_v11  ;;  %v993_v9 = vld [vmem:[#allocation2 + $0x70] sm:$0xff] }
 0x26e   : > { %2053 = vmatprep.mubr.f32.mxu0 %v1290_v12 }
 0x26f   : > { %v2076_v21 = vadd.f32 %v1786_v16, %v986_v14  ;;  %v1405_v24 = vpop.f32.mrb[48].mxu1  ;;  %v994_v16 = vld [vmem:[#allocation2 + $0x78] sm:$0xff] }
 0x270   : > { %v1790_v26 = vpop.f32.mrb[48].mxu0  ;;  %v1407_v28 = vpop.f32.mrb[49].mxu1  ;;  %1669 = vmatmul.mubr.f32.gmra.mrb[154].mxu1 %v1287_v19 }
 0x271   : > { %2140 = vst [vmem:[#allocation2 + $0x38] sm:$0xff] %v2076_v21  ;;  %v1791_v27 = vadd.f32 %v1790_v26, %v1405_v24  ;;  %v1792_v29 = vpop.f32.mrb[49].mxu0  ;;  %2054 = vmatmul.mubr.f32.gmra.mrb[154].mxu0 %v1289_v20  ;;  %1673 = vmatprep.mubr.f32.mxu1 %v1292_v22 }
 0x272   : > { %2058 = vmatprep.mubr.f32.mxu0 %v1294_v23  ;;  %v995_v23 = vld [vmem:[#allocation2 + $0x80] sm:$0xff] }
 0x273   : > { %v2077_v32 = vadd.f32 %v1791_v27, %v987_v25  ;;  %v1410_v35 = vpop.f32.mrb[50].mxu1 }
 0x274   : > { %v1795_v37 = vpop.f32.mrb[50].mxu0  ;;  %v1412_v39 = vpop.f32.mrb[51].mxu1  ;;  %1674 = vmatmul.mubr.f32.gmra.mrb[156].mxu1 %v1291_v30  ;;  %v996_v30 = vld [vmem:[#allocation2 + $0x88] sm:$0xff] }
 0x275   : > { %2141 = vst [vmem:[#allocation2 + $0x40] sm:$0xff] %v2077_v32  ;;  %v1796_v38 = vadd.f32 %v1795_v37, %v1410_v35  ;;  %v1797_v40 = vpop.f32.mrb[51].mxu0  ;;  %2059 = vmatmul.mubr.f32.gmra.mrb[156].mxu0 %v1293_v31  ;;  %1678 = vmatprep.mubr.f32.mxu1 %v1296_v33  ;;  %v997_v37 = vld [vmem:[#allocation2 + $0x90] sm:$0xff] }
 0x276   : > { %2063 = vmatprep.mubr.f32.mxu0 %v1298_v34 }
 0x277   : > { %v2078_v43 = vadd.f32 %v1796_v38, %v988_v36  ;;  %v1415_v44 = vpop.f32.mrb[52].mxu1 }
 0x278   : > { %v1800_v45 = vpop.f32.mrb[52].mxu0  ;;  %v1417_v47 = vpop.f32.mrb[53].mxu1  ;;  %1679 = vmatmul.mubr.f32.gmra.mrb[158].mxu1 %v1295_v41 }
 0x279   : > { %2142 = vst [vmem:[#allocation2 + $0x48] sm:$0xff] %v2078_v43  ;;  %v1801_v46 = vadd.f32 %v1800_v45, %v1415_v44  ;;  %v1802_v48 = vpop.f32.mrb[53].mxu0  ;;  %2064 = vmatmul.mubr.f32.gmra.mrb[158].mxu0 %v1297_v42  ;;  %v998_v44 = vld [vmem:[#allocation2 + $0x98] sm:$0xff] }
 0x27b   : > { %v2079_v49 = vadd.f32 %v1801_v46, %v989_v4  ;;  %v1420_v50 = vpop.f32.mrb[54].mxu1 }
 0x27c   : > { %v1805_v52 = vpop.f32.mrb[54].mxu0  ;;  %v1422_v54 = vpop.f32.mrb[55].mxu1 }
 0x27d   : > { %2143 = vst [vmem:[#allocation2 + $0x50] sm:$0xff] %v2079_v49  ;;  %v1806_v53 = vadd.f32 %v1805_v52, %v1420_v50  ;;  %v1807_v55 = vpop.f32.mrb[55].mxu0  ;;  %v999_v50 = vld [vmem:[#allocation2 + $0xa0] sm:$0xff] }
 0x27f   : > { %v2080_v56 = vadd.f32 %v1806_v53, %v990_v51  ;;  %v1425_v57 = vpop.f32.mrb[56].mxu1 }
 0x280   : > { %v1810_v59 = vpop.f32.mrb[56].mxu0  ;;  %v1427_v61 = vpop.f32.mrb[57].mxu1 }
 0x281   : > { %2144 = vst [vmem:[#allocation2 + $0x58] sm:$0xff] %v2080_v56  ;;  %v1811_v60 = vadd.f32 %v1810_v59, %v1425_v57  ;;  %v1812_v62 = vpop.f32.mrb[57].mxu0  ;;  %v1000_v57 = vld [vmem:[#allocation2 + $0xa8] sm:$0xff] }
 0x283   : > { %v2081_v63 = vadd.f32 %v1811_v60, %v991_v58  ;;  %v1430_v0 = vpop.f32.mrb[58].mxu1 }
 0x284   : > { %v1815_v2 = vpop.f32.mrb[58].mxu0  ;;  %v1432_v5 = vpop.f32.mrb[59].mxu1 }
 0x285   : > { %2145 = vst [vmem:[#allocation2 + $0x60] sm:$0xff] %v2081_v63  ;;  %v1816_v3 = vadd.f32 %v1815_v2, %v1430_v0  ;;  %v1817_v6 = vpop.f32.mrb[59].mxu0  ;;  %v1001_v0 = vld [vmem:[#allocation2 + $0xb0] sm:$0xff] }
 0x287   : > { %v2082_v7 = vadd.f32 %v1816_v3, %v992_v1  ;;  %v1435_v8 = vpop.f32.mrb[60].mxu1 }
 0x288   : > { %v1820_v10 = vpop.f32.mrb[60].mxu0  ;;  %v1437_v12 = vpop.f32.mrb[61].mxu1 }
 0x289   : > { %2146 = vst [vmem:[#allocation2 + $0x68] sm:$0xff] %v2082_v7  ;;  %v1821_v11 = vadd.f32 %v1820_v10, %v1435_v8  ;;  %v1822_v13 = vpop.f32.mrb[61].mxu0  ;;  %v1002_v8 = vld [vmem:[#allocation2 + $0xb8] sm:$0xff] }
 0x28b   : > { %v2083_v14 = vadd.f32 %v1821_v11, %v993_v9  ;;  %v1440_v15 = vpop.f32.mrb[62].mxu1 }
 0x28c   : > { %v1825_v17 = vpop.f32.mrb[62].mxu0  ;;  %v1442_v19 = vpop.f32.mrb[63].mxu1 }
 0x28d   : > { %2147 = vst [vmem:[#allocation2 + $0x70] sm:$0xff] %v2083_v14  ;;  %v1826_v18 = vadd.f32 %v1825_v17, %v1440_v15  ;;  %v1827_v20 = vpop.f32.mrb[63].mxu0  ;;  %v1003_v15 = vld [vmem:[#allocation2 + $0xc0] sm:$0xff] }
 0x28f   : > { %v2084_v21 = vadd.f32 %v1826_v18, %v994_v16  ;;  %v1445_v22 = vpop.f32.mrb[64].mxu1 }
 0x290   : > { %v1830_v24 = vpop.f32.mrb[64].mxu0  ;;  %v1447_v26 = vpop.f32.mrb[65].mxu1 }
 0x291   : > { %2148 = vst [vmem:[#allocation2 + $0x78] sm:$0xff] %v2084_v21  ;;  %v1831_v25 = vadd.f32 %v1830_v24, %v1445_v22  ;;  %v1832_v27 = vpop.f32.mrb[65].mxu0  ;;  %v1004_v22 = vld [vmem:[#allocation2 + $0xc8] sm:$0xff] }
 0x293   : > { %v2085_v28 = vadd.f32 %v1831_v25, %v995_v23  ;;  %v1450_v29 = vpop.f32.mrb[66].mxu1 }
 0x294   : > { %v1835_v31 = vpop.f32.mrb[66].mxu0  ;;  %v1452_v33 = vpop.f32.mrb[67].mxu1 }
 0x295   : > { %2149 = vst [vmem:[#allocation2 + $0x80] sm:$0xff] %v2085_v28  ;;  %v1836_v32 = vadd.f32 %v1835_v31, %v1450_v29  ;;  %v1837_v34 = vpop.f32.mrb[67].mxu0  ;;  %v1005_v29 = vld [vmem:[#allocation2 + $0xd0] sm:$0xff] }
 0x297   : > { %v2086_v35 = vadd.f32 %v1836_v32, %v996_v30  ;;  %v1455_v36 = vpop.f32.mrb[68].mxu1 }
 0x298   : > { %v1840_v38 = vpop.f32.mrb[68].mxu0  ;;  %v1457_v40 = vpop.f32.mrb[69].mxu1 }
 0x299   : > { %2150 = vst [vmem:[#allocation2 + $0x88] sm:$0xff] %v2086_v35  ;;  %v1841_v39 = vadd.f32 %v1840_v38, %v1455_v36  ;;  %v1842_v41 = vpop.f32.mrb[69].mxu0  ;;  %v1006_v36 = vld [vmem:[#allocation2 + $0xd8] sm:$0xff] }
 0x29b   : > { %v2087_v42 = vadd.f32 %v1841_v39, %v997_v37  ;;  %v1460_v43 = vpop.f32.mrb[70].mxu1 }
 0x29c   : > { %v1845_v4 = vpop.f32.mrb[70].mxu0  ;;  %v1462_v46 = vpop.f32.mrb[71].mxu1 }
 0x29d   : > { %2151 = vst [vmem:[#allocation2 + $0x90] sm:$0xff] %v2087_v42  ;;  %v1846_v45 = vadd.f32 %v1845_v4, %v1460_v43  ;;  %v1847_v47 = vpop.f32.mrb[71].mxu0  ;;  %v1007_v43 = vld [vmem:[#allocation2 + $0xe0] sm:$0xff] }
 0x29f   : > { %v2088_v48 = vadd.f32 %v1846_v45, %v998_v44  ;;  %v1465_v49 = vpop.f32.mrb[72].mxu1 }
 0x2a0   : > { %v1850_v51 = vpop.f32.mrb[72].mxu0  ;;  %v1467_v53 = vpop.f32.mrb[73].mxu1 }
 0x2a1   : > { %2152 = vst [vmem:[#allocation2 + $0x98] sm:$0xff] %v2088_v48  ;;  %v1851_v52 = vadd.f32 %v1850_v51, %v1465_v49  ;;  %v1852_v54 = vpop.f32.mrb[73].mxu0  ;;  %v1008_v49 = vld [vmem:[#allocation2 + $0xe8] sm:$0xff] }
 0x2a3   : > { %v2089_v55 = vadd.f32 %v1851_v52, %v999_v50  ;;  %v1470_v56 = vpop.f32.mrb[74].mxu1 }
 0x2a4   : > { %v1855_v58 = vpop.f32.mrb[74].mxu0  ;;  %v1472_v60 = vpop.f32.mrb[75].mxu1 }
 0x2a5   : > { %2153 = vst [vmem:[#allocation2 + $0xa0] sm:$0xff] %v2089_v55  ;;  %v1856_v59 = vadd.f32 %v1855_v58, %v1470_v56  ;;  %v1857_v61 = vpop.f32.mrb[75].mxu0  ;;  %v1009_v56 = vld [vmem:[#allocation2 + $0xf0] sm:$0xff] }
 0x2a7   : > { %v2090_v62 = vadd.f32 %v1856_v59, %v1000_v57  ;;  %v1475_v63 = vpop.f32.mrb[76].mxu1 }
 0x2a8   : > { %v1860_v1 = vpop.f32.mrb[76].mxu0  ;;  %v1477_v3 = vpop.f32.mrb[77].mxu1 }
 0x2a9   : > { %2154 = vst [vmem:[#allocation2 + $0xa8] sm:$0xff] %v2090_v62  ;;  %v1861_v2 = vadd.f32 %v1860_v1, %v1475_v63  ;;  %v1862_v5 = vpop.f32.mrb[77].mxu0  ;;  %v1010_v63 = vld [vmem:[#allocation2 + $0xf8] sm:$0xff] }
 0x2ab   : > { %v2091_v6 = vadd.f32 %v1861_v2, %v1001_v0  ;;  %v1480_v7 = vpop.f32.mrb[78].mxu1 }
 0x2ac   : > { %v1865_v9 = vpop.f32.mrb[78].mxu0  ;;  %v1482_v11 = vpop.f32.mrb[79].mxu1 }
 0x2ad   : > { %2155 = vst [vmem:[#allocation2 + $0xb0] sm:$0xff] %v2091_v6  ;;  %v1866_v10 = vadd.f32 %v1865_v9, %v1480_v7  ;;  %v1867_v12 = vpop.f32.mrb[79].mxu0  ;;  %v1011_v7 = vld [vmem:[#allocation2 + $0x100] sm:$0xff] }
 0x2af   : > { %v2092_v13 = vadd.f32 %v1866_v10, %v1002_v8  ;;  %v1485_v14 = vpop.f32.mrb[80].mxu1 }
 0x2b0   : > { %v1870_v16 = vpop.f32.mrb[80].mxu0  ;;  %v1487_v18 = vpop.f32.mrb[81].mxu1 }
 0x2b1   : > { %2156 = vst [vmem:[#allocation2 + $0xb8] sm:$0xff] %v2092_v13  ;;  %v1871_v17 = vadd.f32 %v1870_v16, %v1485_v14  ;;  %v1872_v19 = vpop.f32.mrb[81].mxu0  ;;  %v1012_v14 = vld [vmem:[#allocation2 + $0x108] sm:$0xff] }
 0x2b3   : > { %v2093_v20 = vadd.f32 %v1871_v17, %v1003_v15  ;;  %v1490_v21 = vpop.f32.mrb[82].mxu1 }
 0x2b4   : > { %v1875_v23 = vpop.f32.mrb[82].mxu0  ;;  %v1492_v25 = vpop.f32.mrb[83].mxu1 }
 0x2b5   : > { %2157 = vst [vmem:[#allocation2 + $0xc0] sm:$0xff] %v2093_v20  ;;  %v1876_v24 = vadd.f32 %v1875_v23, %v1490_v21  ;;  %v1877_v26 = vpop.f32.mrb[83].mxu0  ;;  %v1013_v21 = vld [vmem:[#allocation2 + $0x110] sm:$0xff] }
 0x2b7   : > { %v2094_v27 = vadd.f32 %v1876_v24, %v1004_v22  ;;  %v1495_v28 = vpop.f32.mrb[84].mxu1 }
 0x2b8   : > { %v1880_v30 = vpop.f32.mrb[84].mxu0  ;;  %v1497_v32 = vpop.f32.mrb[85].mxu1 }
 0x2b9   : > { %2158 = vst [vmem:[#allocation2 + $0xc8] sm:$0xff] %v2094_v27  ;;  %v1881_v31 = vadd.f32 %v1880_v30, %v1495_v28  ;;  %v1882_v33 = vpop.f32.mrb[85].mxu0  ;;  %v1014_v28 = vld [vmem:[#allocation2 + $0x118] sm:$0xff] }
 0x2bb   : > { %v2095_v34 = vadd.f32 %v1881_v31, %v1005_v29  ;;  %v1500_v35 = vpop.f32.mrb[86].mxu1 }
 0x2bc   : > { %v1885_v37 = vpop.f32.mrb[86].mxu0  ;;  %v1502_v39 = vpop.f32.mrb[87].mxu1 }
 0x2bd   : > { %2159 = vst [vmem:[#allocation2 + $0xd0] sm:$0xff] %v2095_v34  ;;  %v1886_v38 = vadd.f32 %v1885_v37, %v1500_v35  ;;  %v1887_v40 = vpop.f32.mrb[87].mxu0  ;;  %v1015_v35 = vld [vmem:[#allocation2 + $0x120] sm:$0xff] }
 0x2bf   : > { %v2096_v41 = vadd.f32 %v1886_v38, %v1006_v36  ;;  %v1505_v42 = vpop.f32.mrb[88].mxu1 }
 0x2c0   : > { %v1890_v44 = vpop.f32.mrb[88].mxu0  ;;  %v1507_v45 = vpop.f32.mrb[89].mxu1 }
 0x2c1   : > { %2160 = vst [vmem:[#allocation2 + $0xd8] sm:$0xff] %v2096_v41  ;;  %v1891_v4 = vadd.f32 %v1890_v44, %v1505_v42  ;;  %v1892_v46 = vpop.f32.mrb[89].mxu0  ;;  %v1016_v42 = vld [vmem:[#allocation2 + $0x128] sm:$0xff] }
 0x2c3   : > { %v2097_v47 = vadd.f32 %v1891_v4, %v1007_v43  ;;  %v1510_v48 = vpop.f32.mrb[90].mxu1 }
 0x2c4   : > { %v1895_v50 = vpop.f32.mrb[90].mxu0  ;;  %v1512_v52 = vpop.f32.mrb[91].mxu1 }
 0x2c5   : > { %2161 = vst [vmem:[#allocation2 + $0xe0] sm:$0xff] %v2097_v47  ;;  %v1896_v51 = vadd.f32 %v1895_v50, %v1510_v48  ;;  %v1897_v53 = vpop.f32.mrb[91].mxu0  ;;  %v1017_v48 = vld [vmem:[#allocation2 + $0x130] sm:$0xff] }
 0x2c7   : > { %v2098_v54 = vadd.f32 %v1896_v51, %v1008_v49  ;;  %v1515_v55 = vpop.f32.mrb[92].mxu1 }
 0x2c8   : > { %v1900_v57 = vpop.f32.mrb[92].mxu0  ;;  %v1517_v59 = vpop.f32.mrb[93].mxu1 }
 0x2c9   : > { %2162 = vst [vmem:[#allocation2 + $0xe8] sm:$0xff] %v2098_v54  ;;  %v1901_v58 = vadd.f32 %v1900_v57, %v1515_v55  ;;  %v1902_v60 = vpop.f32.mrb[93].mxu0  ;;  %v1018_v55 = vld [vmem:[#allocation2 + $0x138] sm:$0xff] }
 0x2cb   : > { %v2099_v61 = vadd.f32 %v1901_v58, %v1009_v56  ;;  %v1520_v62 = vpop.f32.mrb[94].mxu1 }
 0x2cc   : > { %v1905_v0 = vpop.f32.mrb[94].mxu0  ;;  %v1522_v2 = vpop.f32.mrb[95].mxu1 }
 0x2cd   : > { %2163 = vst [vmem:[#allocation2 + $0xf0] sm:$0xff] %v2099_v61  ;;  %v1906_v1 = vadd.f32 %v1905_v0, %v1520_v62  ;;  %v1907_v3 = vpop.f32.mrb[95].mxu0  ;;  %v1019_v62 = vld [vmem:[#allocation2 + $0x140] sm:$0xff] }
 0x2cf   : > { %v2100_v5 = vadd.f32 %v1906_v1, %v1010_v63  ;;  %v1525_v6 = vpop.f32.mrb[96].mxu1 }
 0x2d0   : > { %v1910_v8 = vpop.f32.mrb[96].mxu0  ;;  %v1527_v10 = vpop.f32.mrb[97].mxu1 }
 0x2d1   : > { %2164 = vst [vmem:[#allocation2 + $0xf8] sm:$0xff] %v2100_v5  ;;  %v1911_v9 = vadd.f32 %v1910_v8, %v1525_v6  ;;  %v1912_v11 = vpop.f32.mrb[97].mxu0  ;;  %v1020_v6 = vld [vmem:[#allocation2 + $0x148] sm:$0xff] }
 0x2d3   : > { %v2101_v12 = vadd.f32 %v1911_v9, %v1011_v7  ;;  %v1530_v13 = vpop.f32.mrb[98].mxu1 }
 0x2d4   : > { %v1915_v15 = vpop.f32.mrb[98].mxu0  ;;  %v1532_v17 = vpop.f32.mrb[99].mxu1 }
 0x2d5   : > { %2165 = vst [vmem:[#allocation2 + $0x100] sm:$0xff] %v2101_v12  ;;  %v1916_v16 = vadd.f32 %v1915_v15, %v1530_v13  ;;  %v1917_v18 = vpop.f32.mrb[99].mxu0  ;;  %v1021_v13 = vld [vmem:[#allocation2 + $0x150] sm:$0xff] }
 0x2d7   : > { %v2102_v19 = vadd.f32 %v1916_v16, %v1012_v14  ;;  %v1535_v20 = vpop.f32.mrb[100].mxu1 }
 0x2d8   : > { %v1920_v22 = vpop.f32.mrb[100].mxu0  ;;  %v1537_v24 = vpop.f32.mrb[101].mxu1 }
 0x2d9   : > { %2166 = vst [vmem:[#allocation2 + $0x108] sm:$0xff] %v2102_v19  ;;  %v1921_v23 = vadd.f32 %v1920_v22, %v1535_v20  ;;  %v1922_v25 = vpop.f32.mrb[101].mxu0  ;;  %v1022_v20 = vld [vmem:[#allocation2 + $0x158] sm:$0xff] }
 0x2db   : > { %v2103_v26 = vadd.f32 %v1921_v23, %v1013_v21  ;;  %v1540_v27 = vpop.f32.mrb[102].mxu1 }
 0x2dc   : > { %v1925_v29 = vpop.f32.mrb[102].mxu0  ;;  %v1542_v31 = vpop.f32.mrb[103].mxu1 }
 0x2dd   : > { %2167 = vst [vmem:[#allocation2 + $0x110] sm:$0xff] %v2103_v26  ;;  %v1926_v30 = vadd.f32 %v1925_v29, %v1540_v27  ;;  %v1927_v32 = vpop.f32.mrb[103].mxu0  ;;  %v1023_v27 = vld [vmem:[#allocation2 + $0x160] sm:$0xff] }
 0x2df   : > { %v2104_v33 = vadd.f32 %v1926_v30, %v1014_v28  ;;  %v1545_v34 = vpop.f32.mrb[104].mxu1 }
 0x2e0   : > { %v1930_v36 = vpop.f32.mrb[104].mxu0  ;;  %v1547_v38 = vpop.f32.mrb[105].mxu1 }
 0x2e1   : > { %2168 = vst [vmem:[#allocation2 + $0x118] sm:$0xff] %v2104_v33  ;;  %v1931_v37 = vadd.f32 %v1930_v36, %v1545_v34  ;;  %v1932_v39 = vpop.f32.mrb[105].mxu0  ;;  %v1024_v34 = vld [vmem:[#allocation2 + $0x168] sm:$0xff] }
 0x2e3   : > { %v2105_v40 = vadd.f32 %v1931_v37, %v1015_v35  ;;  %v1550_v41 = vpop.f32.mrb[106].mxu1 }
 0x2e4   : > { %v1935_v43 = vpop.f32.mrb[106].mxu0  ;;  %v1552_v4 = vpop.f32.mrb[107].mxu1 }
 0x2e5   : > { %2169 = vst [vmem:[#allocation2 + $0x120] sm:$0xff] %v2105_v40  ;;  %v1936_v44 = vadd.f32 %v1935_v43, %v1550_v41  ;;  %v1937_v45 = vpop.f32.mrb[107].mxu0  ;;  %v1025_v41 = vld [vmem:[#allocation2 + $0x170] sm:$0xff] }
 0x2e7   : > { %v2106_v46 = vadd.f32 %v1936_v44, %v1016_v42  ;;  %v1555_v47 = vpop.f32.mrb[108].mxu1 }
 0x2e8   : > { %v1940_v49 = vpop.f32.mrb[108].mxu0  ;;  %v1557_v51 = vpop.f32.mrb[109].mxu1 }
 0x2e9   : > { %2170 = vst [vmem:[#allocation2 + $0x128] sm:$0xff] %v2106_v46  ;;  %v1941_v50 = vadd.f32 %v1940_v49, %v1555_v47  ;;  %v1942_v52 = vpop.f32.mrb[109].mxu0  ;;  %v1026_v47 = vld [vmem:[#allocation2 + $0x178] sm:$0xff] }
 0x2eb   : > { %v2107_v53 = vadd.f32 %v1941_v50, %v1017_v48  ;;  %v1560_v54 = vpop.f32.mrb[110].mxu1 }
 0x2ec   : > { %v1945_v56 = vpop.f32.mrb[110].mxu0  ;;  %v1562_v58 = vpop.f32.mrb[111].mxu1 }
 0x2ed   : > { %2171 = vst [vmem:[#allocation2 + $0x130] sm:$0xff] %v2107_v53  ;;  %v1946_v57 = vadd.f32 %v1945_v56, %v1560_v54  ;;  %v1947_v59 = vpop.f32.mrb[111].mxu0  ;;  %v1027_v54 = vld [vmem:[#allocation2 + $0x180] sm:$0xff] }
 0x2ef   : > { %v2108_v60 = vadd.f32 %v1946_v57, %v1018_v55  ;;  %v1565_v61 = vpop.f32.mrb[112].mxu1 }
 0x2f0   : > { %v1950_v63 = vpop.f32.mrb[112].mxu0  ;;  %v1567_v1 = vpop.f32.mrb[113].mxu1 }
 0x2f1   : > { %2172 = vst [vmem:[#allocation2 + $0x138] sm:$0xff] %v2108_v60  ;;  %v1951_v0 = vadd.f32 %v1950_v63, %v1565_v61  ;;  %v1952_v2 = vpop.f32.mrb[113].mxu0  ;;  %v1028_v61 = vld [vmem:[#allocation2 + $0x188] sm:$0xff] }
 0x2f3   : > { %v2109_v3 = vadd.f32 %v1951_v0, %v1019_v62  ;;  %v1570_v5 = vpop.f32.mrb[114].mxu1 }
 0x2f4   : > { %v1955_v7 = vpop.f32.mrb[114].mxu0  ;;  %v1572_v9 = vpop.f32.mrb[115].mxu1 }
 0x2f5   : > { %2173 = vst [vmem:[#allocation2 + $0x140] sm:$0xff] %v2109_v3  ;;  %v1956_v8 = vadd.f32 %v1955_v7, %v1570_v5  ;;  %v1957_v10 = vpop.f32.mrb[115].mxu0  ;;  %v1029_v5 = vld [vmem:[#allocation2 + $0x190] sm:$0xff] }
 0x2f7   : > { %v2110_v11 = vadd.f32 %v1956_v8, %v1020_v6  ;;  %v1575_v12 = vpop.f32.mrb[116].mxu1 }
 0x2f8   : > { %v1960_v14 = vpop.f32.mrb[116].mxu0  ;;  %v1577_v16 = vpop.f32.mrb[117].mxu1 }
 0x2f9   : > { %2174 = vst [vmem:[#allocation2 + $0x148] sm:$0xff] %v2110_v11  ;;  %v1961_v15 = vadd.f32 %v1960_v14, %v1575_v12  ;;  %v1962_v17 = vpop.f32.mrb[117].mxu0  ;;  %v1030_v12 = vld [vmem:[#allocation2 + $0x198] sm:$0xff] }
 0x2fb   : > { %v2111_v18 = vadd.f32 %v1961_v15, %v1021_v13  ;;  %v1580_v19 = vpop.f32.mrb[118].mxu1 }
 0x2fc   : > { %v1965_v21 = vpop.f32.mrb[118].mxu0  ;;  %v1582_v23 = vpop.f32.mrb[119].mxu1 }
 0x2fd   : > { %2175 = vst [vmem:[#allocation2 + $0x150] sm:$0xff] %v2111_v18  ;;  %v1966_v22 = vadd.f32 %v1965_v21, %v1580_v19  ;;  %v1967_v24 = vpop.f32.mrb[119].mxu0  ;;  %v1031_v19 = vld [vmem:[#allocation2 + $0x1a0] sm:$0xff] }
 0x2ff   : > { %v2112_v25 = vadd.f32 %v1966_v22, %v1022_v20  ;;  %v1585_v26 = vpop.f32.mrb[120].mxu1 }
 0x300   : > { %v1970_v28 = vpop.f32.mrb[120].mxu0  ;;  %v1587_v30 = vpop.f32.mrb[121].mxu1 }
 0x301   : > { %2176 = vst [vmem:[#allocation2 + $0x158] sm:$0xff] %v2112_v25  ;;  %v1971_v29 = vadd.f32 %v1970_v28, %v1585_v26  ;;  %v1972_v31 = vpop.f32.mrb[121].mxu0  ;;  %v1032_v26 = vld [vmem:[#allocation2 + $0x1a8] sm:$0xff] }
 0x303   : > { %v2113_v32 = vadd.f32 %v1971_v29, %v1023_v27  ;;  %v1590_v33 = vpop.f32.mrb[122].mxu1 }
 0x304   : > { %v1975_v35 = vpop.f32.mrb[122].mxu0  ;;  %v1592_v37 = vpop.f32.mrb[123].mxu1 }
 0x305   : > { %2177 = vst [vmem:[#allocation2 + $0x160] sm:$0xff] %v2113_v32  ;;  %v1976_v36 = vadd.f32 %v1975_v35, %v1590_v33  ;;  %v1977_v38 = vpop.f32.mrb[123].mxu0  ;;  %v1033_v33 = vld [vmem:[#allocation2 + $0x1b0] sm:$0xff] }
 0x307   : > { %v2114_v39 = vadd.f32 %v1976_v36, %v1024_v34  ;;  %v1595_v40 = vpop.f32.mrb[124].mxu1 }
 0x308   : > { %v1980_v42 = vpop.f32.mrb[124].mxu0  ;;  %v1597_v44 = vpop.f32.mrb[125].mxu1 }
 0x309   : > { %2178 = vst [vmem:[#allocation2 + $0x168] sm:$0xff] %v2114_v39  ;;  %v1981_v43 = vadd.f32 %v1980_v42, %v1595_v40  ;;  %v1982_v4 = vpop.f32.mrb[125].mxu0  ;;  %v1034_v40 = vld [vmem:[#allocation2 + $0x1b8] sm:$0xff] }
 0x30b   : > { %v2115_v45 = vadd.f32 %v1981_v43, %v1025_v41  ;;  %v1600_v46 = vpop.f32.mrb[126].mxu1 }
 0x30c   : > { %v1985_v48 = vpop.f32.mrb[126].mxu0  ;;  %v1602_v50 = vpop.f32.mrb[127].mxu1 }
 0x30d   : > { %2179 = vst [vmem:[#allocation2 + $0x170] sm:$0xff] %v2115_v45  ;;  %v1986_v49 = vadd.f32 %v1985_v48, %v1600_v46  ;;  %v1987_v51 = vpop.f32.mrb[127].mxu0  ;;  %v1035_v46 = vld [vmem:[#allocation2 + $0x1c0] sm:$0xff] }
 0x30f   : > { %v2116_v52 = vadd.f32 %v1986_v49, %v1026_v47  ;;  %v1605_v53 = vpop.f32.mrb[128].mxu1 }
 0x310   : > { %v1990_v55 = vpop.f32.mrb[128].mxu0  ;;  %v1607_v57 = vpop.f32.mrb[129].mxu1 }
 0x311   : > { %2180 = vst [vmem:[#allocation2 + $0x178] sm:$0xff] %v2116_v52  ;;  %v1991_v56 = vadd.f32 %v1990_v55, %v1605_v53  ;;  %v1992_v58 = vpop.f32.mrb[129].mxu0  ;;  %v1036_v53 = vld [vmem:[#allocation2 + $0x1c8] sm:$0xff] }
 0x313   : > { %v2117_v59 = vadd.f32 %v1991_v56, %v1027_v54  ;;  %v1610_v60 = vpop.f32.mrb[130].mxu1 }
 0x314   : > { %v1995_v62 = vpop.f32.mrb[130].mxu0  ;;  %v1612_v0 = vpop.f32.mrb[131].mxu1 }
 0x315   : > { %2181 = vst [vmem:[#allocation2 + $0x180] sm:$0xff] %v2117_v59  ;;  %v1996_v63 = vadd.f32 %v1995_v62, %v1610_v60  ;;  %v1997_v1 = vpop.f32.mrb[131].mxu0  ;;  %v1037_v60 = vld [vmem:[#allocation2 + $0x1d0] sm:$0xff] }
 0x317   : > { %v2118_v2 = vadd.f32 %v1996_v63, %v1028_v61  ;;  %v1615_v3 = vpop.f32.mrb[132].mxu1 }
 0x318   : > { %v2000_v6 = vpop.f32.mrb[132].mxu0  ;;  %v1617_v8 = vpop.f32.mrb[133].mxu1 }
 0x319   : > { %2182 = vst [vmem:[#allocation2 + $0x188] sm:$0xff] %v2118_v2  ;;  %v2001_v7 = vadd.f32 %v2000_v6, %v1615_v3  ;;  %v2002_v9 = vpop.f32.mrb[133].mxu0  ;;  %v1038_v3 = vld [vmem:[#allocation2 + $0x1d8] sm:$0xff] }
 0x31b   : > { %v2119_v10 = vadd.f32 %v2001_v7, %v1029_v5  ;;  %v1620_v11 = vpop.f32.mrb[134].mxu1 }
 0x31c   : > { %v2005_v13 = vpop.f32.mrb[134].mxu0  ;;  %v1622_v15 = vpop.f32.mrb[135].mxu1 }
 0x31d   : > { %2183 = vst [vmem:[#allocation2 + $0x190] sm:$0xff] %v2119_v10  ;;  %v2006_v14 = vadd.f32 %v2005_v13, %v1620_v11  ;;  %v2007_v16 = vpop.f32.mrb[135].mxu0  ;;  %v1039_v11 = vld [vmem:[#allocation2 + $0x1e0] sm:$0xff] }
 0x31f   : > { %v2120_v17 = vadd.f32 %v2006_v14, %v1030_v12  ;;  %v1625_v18 = vpop.f32.mrb[136].mxu1 }
 0x320   : > { %v2010_v20 = vpop.f32.mrb[136].mxu0  ;;  %v1627_v22 = vpop.f32.mrb[137].mxu1 }
 0x321   : > { %2184 = vst [vmem:[#allocation2 + $0x198] sm:$0xff] %v2120_v17  ;;  %v2011_v21 = vadd.f32 %v2010_v20, %v1625_v18  ;;  %v2012_v23 = vpop.f32.mrb[137].mxu0  ;;  %v1040_v18 = vld [vmem:[#allocation2 + $0x1e8] sm:$0xff] }
 0x323   : > { %v2121_v24 = vadd.f32 %v2011_v21, %v1031_v19  ;;  %v1630_v25 = vpop.f32.mrb[138].mxu1 }
 0x324   : > { %v2015_v27 = vpop.f32.mrb[138].mxu0  ;;  %v1632_v29 = vpop.f32.mrb[139].mxu1 }
 0x325   : > { %2185 = vst [vmem:[#allocation2 + $0x1a0] sm:$0xff] %v2121_v24  ;;  %v2016_v28 = vadd.f32 %v2015_v27, %v1630_v25  ;;  %v2017_v30 = vpop.f32.mrb[139].mxu0  ;;  %v1041_v25 = vld [vmem:[#allocation2 + $0x1f0] sm:$0xff] }
 0x327   : > { %v2122_v31 = vadd.f32 %v2016_v28, %v1032_v26  ;;  %v1635_v32 = vpop.f32.mrb[140].mxu1 }
 0x328   : > { %v2020_v34 = vpop.f32.mrb[140].mxu0  ;;  %v1637_v36 = vpop.f32.mrb[141].mxu1 }
 0x329   : > { %2186 = vst [vmem:[#allocation2 + $0x1a8] sm:$0xff] %v2122_v31  ;;  %v2021_v35 = vadd.f32 %v2020_v34, %v1635_v32  ;;  %v2022_v37 = vpop.f32.mrb[141].mxu0  ;;  %v1042_v32 = vld [vmem:[#allocation2 + $0x1f8] sm:$0xff] }
 0x32b   : > { %v2123_v38 = vadd.f32 %v2021_v35, %v1033_v33  ;;  %v1640_v39 = vpop.f32.mrb[142].mxu1 }
 0x32c   : > { %v2025_v41 = vpop.f32.mrb[142].mxu0  ;;  %v1642_v43 = vpop.f32.mrb[143].mxu1 }
 0x32d   : > { %2187 = vst [vmem:[#allocation2 + $0x1b0] sm:$0xff] %v2123_v38  ;;  %v2026_v42 = vadd.f32 %v2025_v41, %v1640_v39  ;;  %v2027_v44 = vpop.f32.mrb[143].mxu0  ;;  %v2201_v38 = vld [vmem:[#allocation2] sm:$0xff] (!%p2504_p6)  ;;  %v2202_v39 = vld [vmem:[#allocation2 + $0x8] sm:$0xff] (!%p2504_p6)  ;;  %v2204_v41 = vld [vmem:[#allocation2 + $0x18] sm:$0xff] (!%p2504_p6) }
 0x32e   : > { %2265 = vst [vmem:[%s3111_s29] sm:$0xff] (!%p2504_p6), %v2201_v38  ;;  %2266 = vst [vmem:[%s3111_s29 + $0x8] sm:$0xff] (!%p2504_p6), %v2202_v39  ;;  %v2206_v43 = vld [vmem:[#allocation2 + $0x28] sm:$0xff] (!%p2504_p6)  ;;  %v2207_v44 = vld [vmem:[#allocation2 + $0x30] sm:$0xff] (!%p2504_p6) }
 0x32f   : > { %v2124_v4 = vadd.f32 %v2026_v42, %v1034_v40  ;;  %v1645_v45 = vpop.f32.mrb[144].mxu1  ;;  %v2203_v40 = vld [vmem:[#allocation2 + $0x10] sm:$0xff] (!%p2504_p6)  ;;  %v2205_v42 = vld [vmem:[#allocation2 + $0x20] sm:$0xff] (!%p2504_p6)  ;;  %2268 = vst [vmem:[%s3111_s29 + $0x18] sm:$0xff] (!%p2504_p6), %v2204_v41  ;;  %2270 = vst [vmem:[%s3111_s29 + $0x28] sm:$0xff] (!%p2504_p6), %v2206_v43 }
 0x330   : > { %v2030_v47 = vpop.f32.mrb[144].mxu0  ;;  %v1647_v49 = vpop.f32.mrb[145].mxu1  ;;  %2267 = vst [vmem:[%s3111_s29 + $0x10] sm:$0xff] (!%p2504_p6), %v2203_v40  ;;  %2269 = vst [vmem:[%s3111_s29 + $0x20] sm:$0xff] (!%p2504_p6), %v2205_v42 }
 0x331   : > { %2188 = vst [vmem:[#allocation2 + $0x1b8] sm:$0xff] %v2124_v4  ;;  %v2031_v48 = vadd.f32 %v2030_v47, %v1645_v45  ;;  %v2032_v50 = vpop.f32.mrb[145].mxu0  ;;  %v2208_v4 = vld [vmem:[#allocation2 + $0x38] sm:$0xff] (!%p2504_p6)  ;;  %v2209_v45 = vld [vmem:[#allocation2 + $0x40] sm:$0xff] (!%p2504_p6)  ;;  %2271 = vst [vmem:[%s3111_s29 + $0x30] sm:$0xff] (!%p2504_p6), %v2207_v44 }
 0x332   : > { %2272 = vst [vmem:[%s3111_s29 + $0x38] sm:$0xff] (!%p2504_p6), %v2208_v4  ;;  %2273 = vst [vmem:[%s3111_s29 + $0x40] sm:$0xff] (!%p2504_p6), %v2209_v45  ;;  %v2211_v47 = vld [vmem:[#allocation2 + $0x50] sm:$0xff] (!%p2504_p6)  ;;  %v2213_v49 = vld [vmem:[#allocation2 + $0x60] sm:$0xff] (!%p2504_p6) }
 0x333   : > { %v2125_v51 = vadd.f32 %v2031_v48, %v1035_v46  ;;  %v1650_v52 = vpop.f32.mrb[146].mxu1  ;;  %v2210_v46 = vld [vmem:[#allocation2 + $0x48] sm:$0xff] (!%p2504_p6)  ;;  %v2212_v48 = vld [vmem:[#allocation2 + $0x58] sm:$0xff] (!%p2504_p6)  ;;  %2275 = vst [vmem:[%s3111_s29 + $0x50] sm:$0xff] (!%p2504_p6), %v2211_v47  ;;  %2277 = vst [vmem:[%s3111_s29 + $0x60] sm:$0xff] (!%p2504_p6), %v2213_v49 }
 0x334   : > { %v2035_v54 = vpop.f32.mrb[146].mxu0  ;;  %v1652_v56 = vpop.f32.mrb[147].mxu1  ;;  %2274 = vst [vmem:[%s3111_s29 + $0x48] sm:$0xff] (!%p2504_p6), %v2210_v46  ;;  %2276 = vst [vmem:[%s3111_s29 + $0x58] sm:$0xff] (!%p2504_p6), %v2212_v48  ;;  %v2214_v50 = vld [vmem:[#allocation2 + $0x68] sm:$0xff] (!%p2504_p6) }
 0x335   : > { %2189 = vst [vmem:[#allocation2 + $0x1c0] sm:$0xff] %v2125_v51  ;;  %v2036_v55 = vadd.f32 %v2035_v54, %v1650_v52  ;;  %v2037_v57 = vpop.f32.mrb[147].mxu0  ;;  %v2215_v51 = vld [vmem:[#allocation2 + $0x70] sm:$0xff] (!%p2504_p6)  ;;  %2278 = vst [vmem:[%s3111_s29 + $0x68] sm:$0xff] (!%p2504_p6), %v2214_v50  ;;  %v2216_v52 = vld [vmem:[#allocation2 + $0x78] sm:$0xff] (!%p2504_p6) }
 0x336   : > { %2279 = vst [vmem:[%s3111_s29 + $0x70] sm:$0xff] (!%p2504_p6), %v2215_v51  ;;  %v2218_v54 = vld [vmem:[#allocation2 + $0x88] sm:$0xff] (!%p2504_p6)  ;;  %2280 = vst [vmem:[%s3111_s29 + $0x78] sm:$0xff] (!%p2504_p6), %v2216_v52  ;;  %v2220_v56 = vld [vmem:[#allocation2 + $0x98] sm:$0xff] (!%p2504_p6) }
 0x337   : > { %v2126_v58 = vadd.f32 %v2036_v55, %v1036_v53  ;;  %v1655_v59 = vpop.f32.mrb[148].mxu1  ;;  %v2217_v53 = vld [vmem:[#allocation2 + $0x80] sm:$0xff] (!%p2504_p6)  ;;  %2282 = vst [vmem:[%s3111_s29 + $0x88] sm:$0xff] (!%p2504_p6), %v2218_v54  ;;  %v2219_v55 = vld [vmem:[#allocation2 + $0x90] sm:$0xff] (!%p2504_p6)  ;;  %2284 = vst [vmem:[%s3111_s29 + $0x98] sm:$0xff] (!%p2504_p6), %v2220_v56 }
 0x338   : > { %v2040_v61 = vpop.f32.mrb[148].mxu0  ;;  %v1657_v63 = vpop.f32.mrb[149].mxu1  ;;  %2281 = vst [vmem:[%s3111_s29 + $0x80] sm:$0xff] (!%p2504_p6), %v2217_v53  ;;  %v2221_v57 = vld [vmem:[#allocation2 + $0xa0] sm:$0xff] (!%p2504_p6)  ;;  %2283 = vst [vmem:[%s3111_s29 + $0x90] sm:$0xff] (!%p2504_p6), %v2219_v55 }
 0x339   : > { %2190 = vst [vmem:[#allocation2 + $0x1c8] sm:$0xff] %v2126_v58  ;;  %v2041_v62 = vadd.f32 %v2040_v61, %v1655_v59  ;;  %v2042_v0 = vpop.f32.mrb[149].mxu0  ;;  %2285 = vst [vmem:[%s3111_s29 + $0xa0] sm:$0xff] (!%p2504_p6), %v2221_v57  ;;  %v2222_v58 = vld [vmem:[#allocation2 + $0xa8] sm:$0xff] (!%p2504_p6)  ;;  %v2223_v59 = vld [vmem:[#allocation2 + $0xb0] sm:$0xff] (!%p2504_p6) }
 0x33a   : > { %2286 = vst [vmem:[%s3111_s29 + $0xa8] sm:$0xff] (!%p2504_p6), %v2222_v58  ;;  %2287 = vst [vmem:[%s3111_s29 + $0xb0] sm:$0xff] (!%p2504_p6), %v2223_v59  ;;  %v2225_v61 = vld [vmem:[#allocation2 + $0xc0] sm:$0xff] (!%p2504_p6)  ;;  %v2227_v63 = vld [vmem:[#allocation2 + $0xd0] sm:$0xff] (!%p2504_p6) }
 0x33b   : > { %v2127_v1 = vadd.f32 %v2041_v62, %v1037_v60  ;;  %v1660_v2 = vpop.f32.mrb[150].mxu1  ;;  %v2224_v60 = vld [vmem:[#allocation2 + $0xb8] sm:$0xff] (!%p2504_p6)  ;;  %v2226_v62 = vld [vmem:[#allocation2 + $0xc8] sm:$0xff] (!%p2504_p6)  ;;  %2289 = vst [vmem:[%s3111_s29 + $0xc0] sm:$0xff] (!%p2504_p6), %v2225_v61  ;;  %2291 = vst [vmem:[%s3111_s29 + $0xd0] sm:$0xff] (!%p2504_p6), %v2227_v63 }
 0x33c   : > { %v2045_v5 = vpop.f32.mrb[150].mxu0  ;;  %v1662_v7 = vpop.f32.mrb[151].mxu1  ;;  %2288 = vst [vmem:[%s3111_s29 + $0xb8] sm:$0xff] (!%p2504_p6), %v2224_v60  ;;  %2290 = vst [vmem:[%s3111_s29 + $0xc8] sm:$0xff] (!%p2504_p6), %v2226_v62  ;;  %v2228_v0 = vld [vmem:[#allocation2 + $0xd8] sm:$0xff] (!%p2504_p6) }
 0x33d   : > { %2191 = vst [vmem:[#allocation2 + $0x1d0] sm:$0xff] %v2127_v1  ;;  %v2046_v6 = vadd.f32 %v2045_v5, %v1660_v2  ;;  %v2047_v8 = vpop.f32.mrb[151].mxu0  ;;  %v2229_v1 = vld [vmem:[#allocation2 + $0xe0] sm:$0xff] (!%p2504_p6)  ;;  %v2230_v2 = vld [vmem:[#allocation2 + $0xe8] sm:$0xff] (!%p2504_p6)  ;;  %2292 = vst [vmem:[%s3111_s29 + $0xd8] sm:$0xff] (!%p2504_p6), %v2228_v0 }
 0x33e   : > { %2293 = vst [vmem:[%s3111_s29 + $0xe0] sm:$0xff] (!%p2504_p6), %v2229_v1  ;;  %2294 = vst [vmem:[%s3111_s29 + $0xe8] sm:$0xff] (!%p2504_p6), %v2230_v2  ;;  %v2232_v5 = vld [vmem:[#allocation2 + $0xf8] sm:$0xff] (!%p2504_p6)  ;;  %v2234_v7 = vld [vmem:[#allocation2 + $0x108] sm:$0xff] (!%p2504_p6) }
 0x33f   : > { %v2128_v9 = vadd.f32 %v2046_v6, %v1038_v3  ;;  %v1665_v10 = vpop.f32.mrb[152].mxu1  ;;  %v2231_v3 = vld [vmem:[#allocation2 + $0xf0] sm:$0xff] (!%p2504_p6)  ;;  %v2233_v6 = vld [vmem:[#allocation2 + $0x100] sm:$0xff] (!%p2504_p6)  ;;  %2296 = vst [vmem:[%s3111_s29 + $0xf8] sm:$0xff] (!%p2504_p6), %v2232_v5  ;;  %2298 = vst [vmem:[%s3111_s29 + $0x108] sm:$0xff] (!%p2504_p6), %v2234_v7 }
 0x340   : > { %v2050_v12 = vpop.f32.mrb[152].mxu0  ;;  %v1667_v14 = vpop.f32.mrb[153].mxu1  ;;  %2295 = vst [vmem:[%s3111_s29 + $0xf0] sm:$0xff] (!%p2504_p6), %v2231_v3  ;;  %2297 = vst [vmem:[%s3111_s29 + $0x100] sm:$0xff] (!%p2504_p6), %v2233_v6  ;;  %v2235_v8 = vld [vmem:[#allocation2 + $0x110] sm:$0xff] (!%p2504_p6) }
 0x341   : > { %2192 = vst [vmem:[#allocation2 + $0x1d8] sm:$0xff] %v2128_v9  ;;  %v2051_v13 = vadd.f32 %v2050_v12, %v1665_v10  ;;  %v2052_v15 = vpop.f32.mrb[153].mxu0  ;;  %v2236_v9 = vld [vmem:[#allocation2 + $0x118] sm:$0xff] (!%p2504_p6)  ;;  %2299 = vst [vmem:[%s3111_s29 + $0x110] sm:$0xff] (!%p2504_p6), %v2235_v8  ;;  %v2237_v10 = vld [vmem:[#allocation2 + $0x120] sm:$0xff] (!%p2504_p6) }
 0x342   : > { %2300 = vst [vmem:[%s3111_s29 + $0x118] sm:$0xff] (!%p2504_p6), %v2236_v9  ;;  %v2239_v12 = vld [vmem:[#allocation2 + $0x130] sm:$0xff] (!%p2504_p6)  ;;  %2301 = vst [vmem:[%s3111_s29 + $0x120] sm:$0xff] (!%p2504_p6), %v2237_v10  ;;  %v2241_v14 = vld [vmem:[#allocation2 + $0x140] sm:$0xff] (!%p2504_p6) }
 0x343   : > { %v2129_v16 = vadd.f32 %v2051_v13, %v1039_v11  ;;  %v1670_v17 = vpop.f32.mrb[154].mxu1  ;;  %v2238_v11 = vld [vmem:[#allocation2 + $0x128] sm:$0xff] (!%p2504_p6)  ;;  %2303 = vst [vmem:[%s3111_s29 + $0x130] sm:$0xff] (!%p2504_p6), %v2239_v12  ;;  %v2240_v13 = vld [vmem:[#allocation2 + $0x138] sm:$0xff] (!%p2504_p6)  ;;  %2305 = vst [vmem:[%s3111_s29 + $0x140] sm:$0xff] (!%p2504_p6), %v2241_v14 }
 0x344   : > { %v2055_v19 = vpop.f32.mrb[154].mxu0  ;;  %v1672_v21 = vpop.f32.mrb[155].mxu1  ;;  %2302 = vst [vmem:[%s3111_s29 + $0x128] sm:$0xff] (!%p2504_p6), %v2238_v11  ;;  %v2242_v15 = vld [vmem:[#allocation2 + $0x148] sm:$0xff] (!%p2504_p6)  ;;  %2304 = vst [vmem:[%s3111_s29 + $0x138] sm:$0xff] (!%p2504_p6), %v2240_v13 }
 0x345   : > { %2193 = vst [vmem:[#allocation2 + $0x1e0] sm:$0xff] %v2129_v16  ;;  %v2056_v20 = vadd.f32 %v2055_v19, %v1670_v17  ;;  %v2057_v22 = vpop.f32.mrb[155].mxu0  ;;  %2306 = vst [vmem:[%s3111_s29 + $0x148] sm:$0xff] (!%p2504_p6), %v2242_v15  ;;  %v2243_v16 = vld [vmem:[#allocation2 + $0x150] sm:$0xff] (!%p2504_p6)  ;;  %v2244_v17 = vld [vmem:[#allocation2 + $0x158] sm:$0xff] (!%p2504_p6) }
 0x346   : > { %2307 = vst [vmem:[%s3111_s29 + $0x150] sm:$0xff] (!%p2504_p6), %v2243_v16  ;;  %2308 = vst [vmem:[%s3111_s29 + $0x158] sm:$0xff] (!%p2504_p6), %v2244_v17  ;;  %v2246_v19 = vld [vmem:[#allocation2 + $0x168] sm:$0xff] (!%p2504_p6)  ;;  %v2248_v21 = vld [vmem:[#allocation2 + $0x178] sm:$0xff] (!%p2504_p6) }
 0x347   : > { %v2130_v23 = vadd.f32 %v2056_v20, %v1040_v18  ;;  %v1675_v24 = vpop.f32.mrb[156].mxu1  ;;  %v2245_v18 = vld [vmem:[#allocation2 + $0x160] sm:$0xff] (!%p2504_p6)  ;;  %v2247_v20 = vld [vmem:[#allocation2 + $0x170] sm:$0xff] (!%p2504_p6)  ;;  %2310 = vst [vmem:[%s3111_s29 + $0x168] sm:$0xff] (!%p2504_p6), %v2246_v19  ;;  %2312 = vst [vmem:[%s3111_s29 + $0x178] sm:$0xff] (!%p2504_p6), %v2248_v21 }
 0x348   : > { %v2060_v26 = vpop.f32.mrb[156].mxu0  ;;  %v1677_v28 = vpop.f32.mrb[157].mxu1  ;;  %2309 = vst [vmem:[%s3111_s29 + $0x160] sm:$0xff] (!%p2504_p6), %v2245_v18  ;;  %2311 = vst [vmem:[%s3111_s29 + $0x170] sm:$0xff] (!%p2504_p6), %v2247_v20  ;;  %v2249_v22 = vld [vmem:[#allocation2 + $0x180] sm:$0xff] (!%p2504_p6) }
 0x349   : > { %2194 = vst [vmem:[#allocation2 + $0x1e8] sm:$0xff] %v2130_v23  ;;  %v2061_v27 = vadd.f32 %v2060_v26, %v1675_v24  ;;  %v2062_v29 = vpop.f32.mrb[157].mxu0  ;;  %v2250_v23 = vld [vmem:[#allocation2 + $0x188] sm:$0xff] (!%p2504_p6)  ;;  %v2251_v24 = vld [vmem:[#allocation2 + $0x190] sm:$0xff] (!%p2504_p6)  ;;  %2313 = vst [vmem:[%s3111_s29 + $0x180] sm:$0xff] (!%p2504_p6), %v2249_v22 }
 0x34a   : > { %2314 = vst [vmem:[%s3111_s29 + $0x188] sm:$0xff] (!%p2504_p6), %v2250_v23  ;;  %2315 = vst [vmem:[%s3111_s29 + $0x190] sm:$0xff] (!%p2504_p6), %v2251_v24  ;;  %v2253_v26 = vld [vmem:[#allocation2 + $0x1a0] sm:$0xff] (!%p2504_p6)  ;;  %v2255_v28 = vld [vmem:[#allocation2 + $0x1b0] sm:$0xff] (!%p2504_p6) }
 0x34b   : > { %v2131_v30 = vadd.f32 %v2061_v27, %v1041_v25  ;;  %v1680_v31 = vpop.f32.mrb[158].mxu1  ;;  %2200 = sbr.rel (%p2504_p6) target bundleno = 858 (0x35a), region = 48  ;;  %v2252_v25 = vld [vmem:[#allocation2 + $0x198] sm:$0xff] (!%p2504_p6)  ;;  %v2254_v27 = vld [vmem:[#allocation2 + $0x1a8] sm:$0xff] (!%p2504_p6)  ;;  %2317 = vst [vmem:[%s3111_s29 + $0x1a0] sm:$0xff] (!%p2504_p6), %v2253_v26  ;;  %2319 = vst [vmem:[%s3111_s29 + $0x1b0] sm:$0xff] (!%p2504_p6), %v2255_v28 }
 0x34c   : > { %v2065_v33 = vpop.f32.mrb[158].mxu0  ;;  %v1682_v35 = vpop.f32.mrb[159].mxu1  ;;  %2316 = vst [vmem:[%s3111_s29 + $0x198] sm:$0xff] (!%p2504_p6), %v2252_v25  ;;  %2318 = vst [vmem:[%s3111_s29 + $0x1a8] sm:$0xff] (!%p2504_p6), %v2254_v27  ;;  %v2256_v29 = vld [vmem:[#allocation2 + $0x1b8] sm:$0xff] (!%p2504_p6) }
 0x34d   : > { %2195 = vst [vmem:[#allocation2 + $0x1f0] sm:$0xff] %v2131_v30  ;;  %v2066_v34 = vadd.f32 %v2065_v33, %v1680_v31  ;;  %v2067_v36 = vpop.f32.mrb[159].mxu0  ;;  %v2257_v30 = vld [vmem:[#allocation2 + $0x1c0] sm:$0xff] (!%p2504_p6)  ;;  %2320 = vst [vmem:[%s3111_s29 + $0x1b8] sm:$0xff] (!%p2504_p6), %v2256_v29  ;;  %v2258_v31 = vld [vmem:[#allocation2 + $0x1c8] sm:$0xff] (!%p2504_p6) }
 0x34e   : > { %2321 = vst [vmem:[%s3111_s29 + $0x1c0] sm:$0xff] (!%p2504_p6), %v2257_v30  ;;  %v2260_v33 = vld [vmem:[#allocation2 + $0x1d8] sm:$0xff] (!%p2504_p6)  ;;  %2322 = vst [vmem:[%s3111_s29 + $0x1c8] sm:$0xff] (!%p2504_p6), %v2258_v31 }
 0x34f   : > { %v2132_v37 = vadd.f32 %v2066_v34, %v1042_v32  ;;  %v2259_v32 = vld [vmem:[#allocation2 + $0x1d0] sm:$0xff] (!%p2504_p6)  ;;  %2324 = vst [vmem:[%s3111_s29 + $0x1d8] sm:$0xff] (!%p2504_p6), %v2260_v33  ;;  %v2261_v34 = vld [vmem:[#allocation2 + $0x1e0] sm:$0xff] (!%p2504_p6) }
 0x350   : > { %2323 = vst [vmem:[%s3111_s29 + $0x1d0] sm:$0xff] (!%p2504_p6), %v2259_v32  ;;  %v2262_v35 = vld [vmem:[#allocation2 + $0x1e8] sm:$0xff] (!%p2504_p6)  ;;  %2325 = vst [vmem:[%s3111_s29 + $0x1e0] sm:$0xff] (!%p2504_p6), %v2261_v34 }
 0x351   : > { %2196 = vst [vmem:[#allocation2 + $0x1f8] sm:$0xff] %v2132_v37  ;;  %2326 = vst [vmem:[%s3111_s29 + $0x1e8] sm:$0xff] (!%p2504_p6), %v2262_v35 }
 0x354   : > { %v2263_v36 = vld [vmem:[#allocation2 + $0x1f0] sm:$0xff] }
 0x355   : > { %2327 = vst [vmem:[%s3111_s29 + $0x1f0] sm:$0xff] %v2263_v36 }
 0x358   : > { %v2264_v37 = vld [vmem:[#allocation2 + $0x1f8] sm:$0xff] }
 0x359   : > { %2328 = vst [vmem:[%s3111_s29 + $0x1f8] sm:$0xff] %v2264_v37 }
 0x35a PF: > { %s17_s22 = sadd.s32 1, %s2947_s22   ;;  %s3704_s7 = sld [smem:[#allocation6_spill]] }
 0x35b   : > { %p14_p8 = scmp.ge.s32.totalorder %s17_s22, 6   ;;  %s3705_s15 = smov %s2923_s16 }
 0x35c   : > { %s3706_s16 = smov %s2927_s17  ;;  %s3707_s17 = smov %s3046_s9 }
 0x35d   : > { %s3708_s18 = smov %s2939_s20  ;;  %s3709_s19 = smov %s2943_s21 }
 0x35e   : > { %s3711_s21 = smov %s3717_s25  ;;  %16 = sbr.rel (!%p14_p8) target bundleno = 5 (0x5), region = 87 }
 0x360   : > { %s3710_s20 = smov %s3704_s7 }
 0x365   :  { %2351 = vsyncpa [#allocation4], 1 }
 0x366   :  { %2353 = vsyncpa [#allocation4 + $0x1], 1 }

</bundles_post_ra>
